<compile_context>
chip_gen: v7x
topology: tpu7x:2x2x1
jax: 0.10.0
libtpu: 0.0.40
codegen_flags: <defaults>
</compile_context>

<pallas_src>
import numpy as np
import jax
import jax.numpy as jnp
from jax import lax
from jax.experimental import pallas as pl
from jax.experimental.pallas import tpu as pltpu

# ---------------- config (small shapes consistent with the forward) ----------------
VOCAB = 64          # base tokenizer size
NUM_VECTORS = 4     # placeholder tokens z_0..z_{nv-1} (module default 16; shrunk for small shapes)
SEQ = 16            # text sequence length
D = 32              # text hidden size
N_LAYERS = 2        # text-encoder layers
LAT_H = LAT_W = 8   # latent spatial
LAT_C = 4           # latent channels
N_TOK = LAT_H * LAT_W
OUT_IMAGES = 4      # out_image_count default in forward()
TOKENS = OUT_IMAGES * N_TOK
GUIDANCE = 4.0      # guidance_scale default
NUM_STEPS = 5       # num_inference_steps (small)
STRENGTH = 0.8      # ref_img_strength default


# ---------------- single fused kernel: text encoder + denoising loop + VAE decode -------------
def adaface_fused_kernel(sched_ref,                       # SMEM (num_t, 8): [g, c_z, c_e, ...]
                         x_ref,                           # (2, SEQ, D): [pos prompt, neg prompt] embeddings
                         ln1g_ref, ln1b_ref, wqkv_ref, woa_ref,
                         ln2g_ref, ln2b_ref, w1_ref, b1_ref, w2_ref, b2_ref,
                         lnfg_ref, lnfb_ref,              # final LN
                         zT_ref,                          # (LAT_C, TOKENS) lane-dense initial latents
                         tembT_ref,                       # (num_t, LAT_C, 1) timestep embeddings (column form)
                         wzT_ref, wkv_ref, wo_ref,        # tiny UNet stand-in: (D,LAT_C), (D,2D), (D,LAT_C)
                         wdecT_ref, bdecT_ref,            # tiny VAE decoder stand-in: (3,LAT_C), (3,1)
                         imgT_ref):                       # out: (3, TOKENS) image in [0,1], lane-dense
    # ======== stage 1: CLIP-style text encoder, pos & neg prompts as a batch of 2 ========
    x = x_ref[...]                                        # (2, SEQ, D)
    L = x.shape[1]
    # causal mask built ONCE, reused across all layers
    row = lax.broadcasted_iota(jnp.int32, (L, L), 0)
    col = lax.broadcasted_iota(jnp.int32, (L, L), 1)
    causal = col <= row
    attn_scale = 1.0 / jnp.sqrt(jnp.float32(D))

    def layer_norm(v, g, b):
        mu = jnp.mean(v, axis=-1, keepdims=True)
        var = jnp.mean((v - mu) ** 2, axis=-1, keepdims=True)
        return (v - mu) * lax.rsqrt(var + 1e-5) * g + b

    for l in range(N_LAYERS):                             # static unroll; weights stay VMEM-resident
        # pre-LN causal self-attention (single head), fused QKV projection
        h = layer_norm(x, ln1g_ref[l], ln1b_ref[l])
        qkv = jnp.dot(h, wqkv_ref[l], preferred_element_type=jnp.float32)   # (2, L, 3D)
        q = qkv[..., :D]
        k = qkv[..., D:2 * D]
        v = qkv[..., 2 * D:]
        s = jnp.einsum('bqd,bkd->bqk', q, k, preferred_element_type=jnp.float32) * attn_scale
        s = jnp.where(causal, s, -1e9)
        s = s - jnp.max(s, axis=-1, keepdims=True)
        p = jnp.exp(s)
        p = p * pl.reciprocal(jnp.sum(p, axis=-1, keepdims=True), approx=True)
        attn = jnp.einsum('bqk,bkd->bqd', p, v, preferred_element_type=jnp.float32)
        x = x + jnp.dot(attn, woa_ref[l], preferred_element_type=jnp.float32)
        # pre-LN MLP with quick-GELU (as in CLIP)
        h2 = layer_norm(x, ln2g_ref[l], ln2b_ref[l])
        m = jnp.dot(h2, w1_ref[l], preferred_element_type=jnp.float32) + b1_ref[l]
        m = m * jax.nn.sigmoid(1.702 * m)
        x = x + jnp.dot(m, w2_ref[l], preferred_element_type=jnp.float32) + b2_ref[l]

    encoded = layer_norm(x, lnfg_ref[...], lnfb_ref[...])   # (2, SEQ, D); never leaves VMEM

    # ======== stage 2: denoising loop prologue (timestep-invariant, hoisted out of loop) ========
    # Stacked [cond; uncond] context and a single stacked K/V projection.
    ctx2 = jnp.concatenate([encoded[0], encoded[1]], axis=0)                 # (2*SEQ, D)
    kv = jnp.dot(ctx2, wkv_ref[...], preferred_element_type=jnp.float32)     # (2*SEQ, 2D)
    kk = kv[:, :D]                                                           # (2*SEQ, D)
    vv = kv[:, D:]                                                           # (2*SEQ, D)
    # Fold wz into the attention-logit matrix:  sT = Mt @ latT
    Mt = jnp.dot(kk, wzT_ref[...], preferred_element_type=jnp.float32) * attn_scale   # (2*SEQ, LAT_C)
    # Fold wo and the CFG combine (g / 1-g) into the value matrix:  epsT = VfoldT @ PT
    g = sched_ref[0, 0]
    cfg_col = lax.broadcasted_iota(jnp.int32, (1, 2 * SEQ), 1)
    cfg = jnp.where(cfg_col < SEQ, g, 1.0 - g)                               # (1, 2*SEQ)
    vo = jnp.dot(vv, wo_ref[...], preferred_element_type=jnp.float32)        # (2*SEQ, LAT_C)
    VfoldT = vo.T * cfg                                                      # (LAT_C, 2*SEQ)

    num_t = tembT_ref.shape[0]

    # ======== stage 2b: denoising loop — 2 matmuls + 2 tiny softmaxes + fused DDIM per step ====
    def step(s_idx, latT):                                 # latT: (LAT_C, TOKENS), loop-carried (no scratch)
        c_z = sched_ref[s_idx, 1]                          # sqrt(a_prev)/sqrt(a_t)
        c_e = sched_ref[s_idx, 2]                          # sqrt(1-a_prev) - c_z*sqrt(1-a_t)
        temb = tembT_ref[s_idx]                            # (LAT_C, 1)
        sT = jnp.dot(Mt, latT, preferred_element_type=jnp.float32)           # (2*SEQ, TOKENS)
        sc = sT[:SEQ]                                      # cond logits
        su = sT[SEQ:]                                      # uncond logits
        sc = sc - jnp.max(sc, axis=0, keepdims=True)
        pc = jnp.exp(sc)
        pc = pc * pl.reciprocal(jnp.sum(pc, axis=0, keepdims=True), approx=True)
        su = su - jnp.max(su, axis=0, keepdims=True)
        pu = jnp.exp(su)
        pu = pu * pl.reciprocal(jnp.sum(pu, axis=0, keepdims=True), approx=True)
        PT = jnp.concatenate([pc, pu], axis=0)             # (2*SEQ, TOKENS)
        epsT = jnp.dot(VfoldT, PT, preferred_element_type=jnp.float32) + temb  # CFG already folded in
        return c_z * latT + c_e * epsT                     # DDIM update (coefficients precomputed host-side)

    latT = lax.fori_loop(0, num_t, step, zT_ref[...])

    # ======== stage 3: tiny VAE-decoder stand-in, lane-dense (3, TOKENS) output ========
    yT = jnp.dot(wdecT_ref[...], latT, preferred_element_type=jnp.float32) + bdecT_ref[...]
    imgT_ref[...] = (jnp.tanh(yT) + 1.0) * 0.5


def adaface_pallas_call(sched, x_emb, enc_w, final_ln, zT, tembT, unet_t, vae_t):
    vmem = pl.BlockSpec(memory_space=pltpu.MemorySpace.VMEM)
    smem = pl.BlockSpec(memory_space=pltpu.MemorySpace.SMEM)
    n_vmem = 1 + len(enc_w) + len(final_ln) + 2 + len(unet_t) + len(vae_t)
    return pl.pallas_call(
        adaface_fused_kernel,
        out_shape=jax.ShapeDtypeStruct((3, TOKENS), jnp.float32),
        in_specs=[smem] + [vmem] * n_vmem,
        out_specs=vmem,
    )(sched, x_emb, *enc_w, *final_ln, zT, tembT, *unet_t, *vae_t)


# ---------------- whole forward pass under one jit (single pallas launch inside) ----------------
@jax.jit
def adaface_forward(token_embedding, pos_embedding, enc_weights, final_ln,
                    ids2, zT, sched, tembT, unet_params, wdec, bdec):
    # encode_prompt glue: embedding gather for [prompt, negative_prompt]
    x = token_embedding[ids2] + pos_embedding[None]            # (2, SEQ, D)
    # weight stacking / transposes (once per call, tiny XLA ops outside the kernel)
    ln1g, ln1b, wq, wk, wv, woa, ln2g, ln2b, w1, b1, w2, b2 = enc_weights
    enc_w = (ln1g, ln1b, jnp.concatenate([wq, wk, wv], axis=-1), woa,
             ln2g, ln2b, w1, b1, w2, b2)
    wz, wku, wvu, wou = unet_params
    unet_t = (wz.T, jnp.concatenate([wku, wvu], axis=-1), wou)
    vae_t = (wdec.T, bdec.T)
    # NOTE: the pipeline's .repeat(out_image_count, 1, 1) is not materialized; the shared
    # (SEQ, D) contexts serve all OUT_IMAGES inside the fused kernel.
    imgT = adaface_pallas_call(sched, x, enc_w, final_ln, zT, tembT, unet_t, vae_t)  # (3, TOKENS)
    return imgT.T.reshape(OUT_IMAGES, LAT_H, LAT_W, 3)


# ---------------- synthetic deterministic parameters ----------------
def init_params(key):
    ks = jax.random.split(key, 16)
    it = iter(range(16))
    n = lambda shape, s=0.05: s * jax.random.normal(ks[next(it)], shape, jnp.float32)
    token_embedding = n((VOCAB + NUM_VECTORS, D), 0.02)
    pos_embedding = n((SEQ, D), 0.02)
    enc_weights = (
        jnp.ones((N_LAYERS, 1, D)), jnp.zeros((N_LAYERS, 1, D)),           # ln1 gamma/beta
        n((N_LAYERS, D, D)), n((N_LAYERS, D, D)),                          # wq, wk
        n((N_LAYERS, D, D)), n((N_LAYERS, D, D)),                          # wv, wo
        jnp.ones((N_LAYERS, 1, D)), jnp.zeros((N_LAYERS, 1, D)),           # ln2 gamma/beta
        n((N_LAYERS, D, 4 * D)), jnp.zeros((N_LAYERS, 1, 4 * D)),          # mlp fc1 w/b
        n((N_LAYERS, 4 * D, D)), jnp.zeros((N_LAYERS, 1, D)),              # mlp fc2 w/b
    )
    final_ln = (jnp.ones((1, D)), jnp.zeros((1, D)))
    # subj_basis_generator stand-in
    id_emb = n((1, 16), 1.0)
    w_basis = n((16, NUM_VECTORS * D))
    # UNet stand-in
    unet_params = (n((LAT_C, D)), n((D, D)), n((D, D)), n((D, LAT_C)))
    # VAE decoder stand-in
    wdec, bdec = n((LAT_C, 3), 0.5), jnp.zeros((1, 3))
    return (token_embedding, pos_embedding, enc_weights, final_ln,
            id_emb, w_basis, unet_params, wdec, bdec)


if __name__ == "__main__":
    key = jax.random.PRNGKey(0)
    kp, kn, kg = jax.random.split(key, 3)
    (token_embedding, pos_embedding, enc_weights, final_ln,
     id_emb, w_basis, unet_params, wdec, bdec) = init_params(kp)

    # --- extend_tokenizer_and_text_encoder + generate_adaface_embeddings + update_text_encoder_subj_embs ---
    placeholder_ids = jnp.arange(VOCAB, VOCAB + NUM_VECTORS, dtype=jnp.int32)
    subj_embs = (id_emb @ w_basis).reshape(NUM_VECTORS, D)     # subj_basis_generator stand-in (tiny matmul, glue)
    token_embedding = token_embedding.at[placeholder_ids].set(subj_embs)

    # --- update_prompt / encode_prompt ---
    # TODO(synk): string tokenization + regex prompt rewriting + insightface id-embedding extraction
    #             have no Pallas equivalent; token ids / id_emb built directly.
    base_prompt_ids = ((jnp.arange(SEQ - NUM_VECTORS) * 7) % VOCAB).astype(jnp.int32) + 1
    prompt_ids = jnp.concatenate([placeholder_ids, base_prompt_ids])        # "z" -> "z_0 ... z_k" prompt
    neg_prompt_ids = ((jnp.arange(SEQ) * 3) % VOCAB).astype(jnp.int32)      # fixed negative prompt tokens
    ids2 = jnp.stack([prompt_ids, neg_prompt_ids])                          # encode both prompts in one pass

    # --- DDIM scheduler setup (host-side precompute; DDIM update folded into c_z, c_e) ---
    betas = np.linspace(0.00085 ** 0.5, 0.012 ** 0.5, 1000) ** 2            # scaled_linear
    alphas_cumprod = np.cumprod(1.0 - betas)
    step_ratio = 1000 // NUM_STEPS
    timesteps = (np.arange(NUM_STEPS) * step_ratio)[::-1] + 1               # steps_offset=1
    init_timestep = min(int(NUM_STEPS * STRENGTH), NUM_STEPS)
    t_start = max(NUM_STEPS - init_timestep, 0)
    timesteps = timesteps[t_start:]

    sched_rows, temb_rows = [], []
    for t in timesteps:
        a_t = float(alphas_cumprod[t])
        prev_t = int(t) - step_ratio
        a_prev = float(alphas_cumprod[prev_t]) if prev_t >= 0 else float(alphas_cumprod[0])  # set_alpha_to_one=False
        c_z = np.sqrt(a_prev) / np.sqrt(a_t)
        c_e = np.sqrt(1.0 - a_prev) - c_z * np.sqrt(1.0 - a_t)
        sched_rows.append([GUIDANCE, c_z, c_e, 0.0, 0.0, 0.0, 0.0, 0.0])
        tf = float(t)
        temb_rows.append([0.1 * np.sin(tf * 0.01), 0.1 * np.cos(tf * 0.01),
                          0.1 * np.sin(tf * 0.1), 0.1 * np.cos(tf * 0.1)])
    sched = jnp.asarray(np.array(sched_rows, dtype=np.float32))             # (num_t, 8), read from SMEM
    tembT = jnp.asarray(np.array(temb_rows, dtype=np.float32).reshape(-1, LAT_C, 1))  # (num_t, LAT_C, 1)

    # --- forward(noise, ...): img2img-style noising of the "reference" latents ---
    noise = jax.random.normal(kn, (OUT_IMAGES, LAT_H, LAT_W, LAT_C), jnp.float32)
    # TODO(synk): real pipeline VAE-encodes the reference image; latent-shaped input used directly here.
    init_latents = noise.reshape(TOKENS, LAT_C)                             # flattened token layout
    a0 = float(alphas_cumprod[timesteps[0]])
    gauss = jax.random.normal(kg, (TOKENS, LAT_C), jnp.float32)
    latents0 = np.sqrt(a0) * init_latents + np.sqrt(1.0 - a0) * gauss
    zT = latents0.T                                                          # (LAT_C, TOKENS) lane-dense

    images = adaface_forward(token_embedding, pos_embedding, enc_weights, final_ln,
                             ids2, zT, sched, tembT, unet_params, wdec, bdec)
    images = jax.block_until_ready(images)
    assert images.shape == (OUT_IMAGES, LAT_H, LAT_W, 3)
    assert bool(jnp.all(jnp.isfinite(images)))
    print("KERNEL_OK")
</pallas_src>

<mosaic_0001>
module attributes {stable_mosaic.version = 11 : i64} {
  func.func @adaface_fused_kernel(%arg0: memref<4x8xf32, #tpu.memory_space<smem>>, %arg1: memref<2x16x32xf32, #tpu.memory_space<vmem>>, %arg2: memref<2x1x32xf32, #tpu.memory_space<vmem>>, %arg3: memref<2x1x32xf32, #tpu.memory_space<vmem>>, %arg4: memref<2x32x96xf32, #tpu.memory_space<vmem>>, %arg5: memref<2x32x32xf32, #tpu.memory_space<vmem>>, %arg6: memref<2x1x32xf32, #tpu.memory_space<vmem>>, %arg7: memref<2x1x32xf32, #tpu.memory_space<vmem>>, %arg8: memref<2x32x128xf32, #tpu.memory_space<vmem>>, %arg9: memref<2x1x128xf32, #tpu.memory_space<vmem>>, %arg10: memref<2x128x32xf32, #tpu.memory_space<vmem>>, %arg11: memref<2x1x32xf32, #tpu.memory_space<vmem>>, %arg12: memref<1x32xf32, #tpu.memory_space<vmem>>, %arg13: memref<1x32xf32, #tpu.memory_space<vmem>>, %arg14: memref<4x256xf32, #tpu.memory_space<vmem>>, %arg15: memref<4x4x1xf32, #tpu.memory_space<vmem>>, %arg16: memref<32x4xf32, #tpu.memory_space<vmem>>, %arg17: memref<32x64xf32, #tpu.memory_space<vmem>>, %arg18: memref<32x4xf32, #tpu.memory_space<vmem>>, %arg19: memref<3x4xf32, #tpu.memory_space<vmem>>, %arg20: memref<3x1xf32, #tpu.memory_space<vmem>>, %arg21: memref<3x256xf32, #tpu.memory_space<vmem>>) attributes {dimension_semantics = [], scalar_prefetch = 0 : i64, scratch_operands = 0 : i64, tpu.core_type = #tpu.core_type<tc>} {
    %c0 = arith.constant 0 : index
    %c0_0 = arith.constant 0 : index
    %c0_1 = arith.constant 0 : index
    %0 = vector.load %arg1[%c0, %c0_0, %c0_1] : memref<2x16x32xf32, #tpu.memory_space<vmem>>, vector<2x16x32xf32>
    %1 = tpu.iota {dimensions = array<i32: 0>} : vector<16x16xi32>
    %2 = tpu.iota {dimensions = array<i32: 1>} : vector<16x16xi32>
    %3 = arith.cmpi sle, %2, %1 : vector<16x16xi32>
    %cst = arith.constant 3.200000e+01 : f32
    %4 = math.sqrt %cst : f32
    %cst_2 = arith.constant 1.000000e+00 : f32
    %5 = arith.divf %cst_2, %4 : f32
    %c0_3 = arith.constant 0 : index
    %c0_4 = arith.constant 0 : index
    %c0_5 = arith.constant 0 : index
    %6 = vector.load %arg2[%c0_3, %c0_4, %c0_5] : memref<2x1x32xf32, #tpu.memory_space<vmem>>, vector<1x1x32xf32>
    %7 = vector.shape_cast %6 : vector<1x1x32xf32> to vector<1x32xf32>
    %c0_6 = arith.constant 0 : index
    %c0_7 = arith.constant 0 : index
    %c0_8 = arith.constant 0 : index
    %8 = vector.load %arg3[%c0_6, %c0_7, %c0_8] : memref<2x1x32xf32, #tpu.memory_space<vmem>>, vector<1x1x32xf32>
    %9 = vector.shape_cast %8 : vector<1x1x32xf32> to vector<1x32xf32>
    %cst_9 = arith.constant dense<0.000000e+00> : vector<2x16xf32>
    %10 = vector.multi_reduction <add>, %0, %cst_9 [2] : vector<2x16x32xf32> to vector<2x16xf32>
    %11 = vector.shape_cast %10 : vector<2x16xf32> to vector<2x16x1xf32>
    %cst_10 = arith.constant 3.200000e+01 : f32
    %12 = vector.broadcast %cst_10 : f32 to vector<2x16x1xf32>
    %13 = arith.divf %11, %12 : vector<2x16x1xf32>
    %14 = vector.broadcast %13 : vector<2x16x1xf32> to vector<2x16x32xf32>
    %15 = arith.subf %0, %14 : vector<2x16x32xf32>
    %16 = arith.mulf %15, %15 : vector<2x16x32xf32>
    %cst_11 = arith.constant dense<0.000000e+00> : vector<2x16xf32>
    %17 = vector.multi_reduction <add>, %16, %cst_11 [2] : vector<2x16x32xf32> to vector<2x16xf32>
    %18 = vector.shape_cast %17 : vector<2x16xf32> to vector<2x16x1xf32>
    %cst_12 = arith.constant 3.200000e+01 : f32
    %19 = vector.broadcast %cst_12 : f32 to vector<2x16x1xf32>
    %20 = arith.divf %18, %19 : vector<2x16x1xf32>
    %21 = vector.broadcast %13 : vector<2x16x1xf32> to vector<2x16x32xf32>
    %22 = arith.subf %0, %21 : vector<2x16x32xf32>
    %cst_13 = arith.constant 9.99999974E-6 : f32
    %23 = vector.broadcast %cst_13 : f32 to vector<2x16x1xf32>
    %24 = arith.addf %20, %23 : vector<2x16x1xf32>
    %25 = math.rsqrt %24 : vector<2x16x1xf32>
    %26 = vector.broadcast %25 : vector<2x16x1xf32> to vector<2x16x32xf32>
    %27 = arith.mulf %22, %26 : vector<2x16x32xf32>
    %28 = vector.shape_cast %7 : vector<1x32xf32> to vector<1x1x32xf32>
    %29 = vector.broadcast %28 : vector<1x1x32xf32> to vector<2x16x32xf32>
    %30 = arith.mulf %27, %29 : vector<2x16x32xf32>
    %31 = vector.shape_cast %9 : vector<1x32xf32> to vector<1x1x32xf32>
    %32 = vector.broadcast %31 : vector<1x1x32xf32> to vector<2x16x32xf32>
    %33 = arith.addf %30, %32 : vector<2x16x32xf32>
    %c0_14 = arith.constant 0 : index
    %c0_15 = arith.constant 0 : index
    %c0_16 = arith.constant 0 : index
    %34 = vector.load %arg4[%c0_14, %c0_15, %c0_16] : memref<2x32x96xf32, #tpu.memory_space<vmem>>, vector<1x32x96xf32>
    %35 = vector.shape_cast %34 : vector<1x32x96xf32> to vector<32x96xf32>
    %cst_17 = arith.constant dense<0.000000e+00> : vector<2x16x96xf32>
    %36 = tpu.matmul %33, %35, %cst_17 {dimension_numbers = #tpu.dot_dimension_numbers<[2], [0], [0, 1], [1], [0, 0, 0, 1, 1, 1], [], []>} : vector<2x16x32xf32>, vector<32x96xf32>, vector<2x16x96xf32> -> vector<2x16x96xf32>
    %37 = vector.extract_strided_slice %36 {offsets = [0, 0, 0], sizes = [2, 16, 32], strides = [1, 1, 1]} : vector<2x16x96xf32> to vector<2x16x32xf32>
    %38 = vector.extract_strided_slice %36 {offsets = [0, 0, 32], sizes = [2, 16, 32], strides = [1, 1, 1]} : vector<2x16x96xf32> to vector<2x16x32xf32>
    %39 = vector.extract_strided_slice %36 {offsets = [0, 0, 64], sizes = [2, 16, 32], strides = [1, 1, 1]} : vector<2x16x96xf32> to vector<2x16x32xf32>
    "tpu.trace_start"() <{level = 10 : i32, message = "bqd,bkd->bqk"}> : () -> ()
    %cst_18 = arith.constant dense<0.000000e+00> : vector<2x16x16xf32>
    %40 = tpu.matmul %37, %38, %cst_18 {dimension_numbers = #tpu.dot_dimension_numbers<[2], [2], [1], [1], [0, 0, 0, 1, 1, 1], [0], [0]>} : vector<2x16x32xf32>, vector<2x16x32xf32>, vector<2x16x16xf32> -> vector<2x16x16xf32>
    "tpu.trace_stop"() : () -> ()
    %41 = vector.broadcast %5 : f32 to vector<2x16x16xf32>
    %42 = arith.mulf %40, %41 : vector<2x16x16xf32>
    %cst_19 = arith.constant -1.000000e+09 : f32
    %43 = vector.shape_cast %3 : vector<16x16xi1> to vector<1x16x16xi1>
    %44 = vector.broadcast %43 : vector<1x16x16xi1> to vector<2x16x16xi1>
    %45 = vector.broadcast %cst_19 : f32 to vector<2x16x16xf32>
    %46 = arith.select %44, %42, %45 : vector<2x16x16xi1>, vector<2x16x16xf32>
    %cst_20 = arith.constant dense<0xFF800000> : vector<2x16xf32>
    %47 = vector.multi_reduction <maximumf>, %46, %cst_20 [2] : vector<2x16x16xf32> to vector<2x16xf32>
    %48 = vector.shape_cast %47 : vector<2x16xf32> to vector<2x16x1xf32>
    %49 = vector.broadcast %48 : vector<2x16x1xf32> to vector<2x16x16xf32>
    %50 = arith.subf %46, %49 : vector<2x16x16xf32>
    %51 = math.exp %50 : vector<2x16x16xf32>
    %cst_21 = arith.constant dense<0.000000e+00> : vector<2x16xf32>
    %52 = vector.multi_reduction <add>, %51, %cst_21 [2] : vector<2x16x16xf32> to vector<2x16xf32>
    %53 = vector.shape_cast %52 : vector<2x16xf32> to vector<2x16x1xf32>
    %54 = tpu.reciprocal %53 {approx = true} : vector<2x16x1xf32> -> vector<2x16x1xf32>
    %55 = vector.broadcast %54 : vector<2x16x1xf32> to vector<2x16x16xf32>
    %56 = arith.mulf %51, %55 : vector<2x16x16xf32>
    "tpu.trace_start"() <{level = 10 : i32, message = "bqk,bkd->bqd"}> : () -> ()
    %cst_22 = arith.constant dense<0.000000e+00> : vector<2x16x32xf32>
    %57 = tpu.matmul %56, %39, %cst_22 {dimension_numbers = #tpu.dot_dimension_numbers<[2], [1], [1], [2], [0, 0, 0, 1, 1, 2], [0], [0]>} : vector<2x16x16xf32>, vector<2x16x32xf32>, vector<2x16x32xf32> -> vector<2x16x32xf32>
    "tpu.trace_stop"() : () -> ()
    %c0_23 = arith.constant 0 : index
    %c0_24 = arith.constant 0 : index
    %c0_25 = arith.constant 0 : index
    %58 = vector.load %arg5[%c0_23, %c0_24, %c0_25] : memref<2x32x32xf32, #tpu.memory_space<vmem>>, vector<1x32x32xf32>
    %59 = vector.shape_cast %58 : vector<1x32x32xf32> to vector<32x32xf32>
    %cst_26 = arith.constant dense<0.000000e+00> : vector<2x16x32xf32>
    %60 = tpu.matmul %57, %59, %cst_26 {dimension_numbers = #tpu.dot_dimension_numbers<[2], [0], [0, 1], [1], [0, 0, 0, 1, 1, 1], [], []>} : vector<2x16x32xf32>, vector<32x32xf32>, vector<2x16x32xf32> -> vector<2x16x32xf32>
    %61 = arith.addf %0, %60 : vector<2x16x32xf32>
    %c0_27 = arith.constant 0 : index
    %c0_28 = arith.constant 0 : index
    %c0_29 = arith.constant 0 : index
    %62 = vector.load %arg6[%c0_27, %c0_28, %c0_29] : memref<2x1x32xf32, #tpu.memory_space<vmem>>, vector<1x1x32xf32>
    %63 = vector.shape_cast %62 : vector<1x1x32xf32> to vector<1x32xf32>
    %c0_30 = arith.constant 0 : index
    %c0_31 = arith.constant 0 : index
    %c0_32 = arith.constant 0 : index
    %64 = vector.load %arg7[%c0_30, %c0_31, %c0_32] : memref<2x1x32xf32, #tpu.memory_space<vmem>>, vector<1x1x32xf32>
    %65 = vector.shape_cast %64 : vector<1x1x32xf32> to vector<1x32xf32>
    %cst_33 = arith.constant dense<0.000000e+00> : vector<2x16xf32>
    %66 = vector.multi_reduction <add>, %61, %cst_33 [2] : vector<2x16x32xf32> to vector<2x16xf32>
    %67 = vector.shape_cast %66 : vector<2x16xf32> to vector<2x16x1xf32>
    %cst_34 = arith.constant 3.200000e+01 : f32
    %68 = vector.broadcast %cst_34 : f32 to vector<2x16x1xf32>
    %69 = arith.divf %67, %68 : vector<2x16x1xf32>
    %70 = vector.broadcast %69 : vector<2x16x1xf32> to vector<2x16x32xf32>
    %71 = arith.subf %61, %70 : vector<2x16x32xf32>
    %72 = arith.mulf %71, %71 : vector<2x16x32xf32>
    %cst_35 = arith.constant dense<0.000000e+00> : vector<2x16xf32>
    %73 = vector.multi_reduction <add>, %72, %cst_35 [2] : vector<2x16x32xf32> to vector<2x16xf32>
    %74 = vector.shape_cast %73 : vector<2x16xf32> to vector<2x16x1xf32>
    %cst_36 = arith.constant 3.200000e+01 : f32
    %75 = vector.broadcast %cst_36 : f32 to vector<2x16x1xf32>
    %76 = arith.divf %74, %75 : vector<2x16x1xf32>
    %77 = vector.broadcast %69 : vector<2x16x1xf32> to vector<2x16x32xf32>
    %78 = arith.subf %61, %77 : vector<2x16x32xf32>
    %cst_37 = arith.constant 9.99999974E-6 : f32
    %79 = vector.broadcast %cst_37 : f32 to vector<2x16x1xf32>
    %80 = arith.addf %76, %79 : vector<2x16x1xf32>
    %81 = math.rsqrt %80 : vector<2x16x1xf32>
    %82 = vector.broadcast %81 : vector<2x16x1xf32> to vector<2x16x32xf32>
    %83 = arith.mulf %78, %82 : vector<2x16x32xf32>
    %84 = vector.shape_cast %63 : vector<1x32xf32> to vector<1x1x32xf32>
    %85 = vector.broadcast %84 : vector<1x1x32xf32> to vector<2x16x32xf32>
    %86 = arith.mulf %83, %85 : vector<2x16x32xf32>
    %87 = vector.shape_cast %65 : vector<1x32xf32> to vector<1x1x32xf32>
    %88 = vector.broadcast %87 : vector<1x1x32xf32> to vector<2x16x32xf32>
    %89 = arith.addf %86, %88 : vector<2x16x32xf32>
    %c0_38 = arith.constant 0 : index
    %c0_39 = arith.constant 0 : index
    %c0_40 = arith.constant 0 : index
    %90 = vector.load %arg8[%c0_38, %c0_39, %c0_40] : memref<2x32x128xf32, #tpu.memory_space<vmem>>, vector<1x32x128xf32>
    %91 = vector.shape_cast %90 : vector<1x32x128xf32> to vector<32x128xf32>
    %cst_41 = arith.constant dense<0.000000e+00> : vector<2x16x128xf32>
    %92 = tpu.matmul %89, %91, %cst_41 {dimension_numbers = #tpu.dot_dimension_numbers<[2], [0], [0, 1], [1], [0, 0, 0, 1, 1, 1], [], []>} : vector<2x16x32xf32>, vector<32x128xf32>, vector<2x16x128xf32> -> vector<2x16x128xf32>
    %c0_42 = arith.constant 0 : index
    %c0_43 = arith.constant 0 : index
    %c0_44 = arith.constant 0 : index
    %93 = vector.load %arg9[%c0_42, %c0_43, %c0_44] : memref<2x1x128xf32, #tpu.memory_space<vmem>>, vector<1x1x128xf32>
    %94 = vector.shape_cast %93 : vector<1x1x128xf32> to vector<1x128xf32>
    %95 = vector.shape_cast %94 : vector<1x128xf32> to vector<1x1x128xf32>
    %96 = vector.broadcast %95 : vector<1x1x128xf32> to vector<2x16x128xf32>
    %97 = arith.addf %92, %96 : vector<2x16x128xf32>
    %cst_45 = arith.constant 1.702000e+00 : f32
    %98 = vector.broadcast %cst_45 : f32 to vector<2x16x128xf32>
    %99 = arith.mulf %98, %97 : vector<2x16x128xf32>
    %100 = arith.negf %99 : vector<2x16x128xf32>
    %101 = math.exp %100 : vector<2x16x128xf32>
    %cst_46 = arith.constant 1.000000e+00 : f32
    %102 = vector.broadcast %cst_46 : f32 to vector<2x16x128xf32>
    %103 = arith.addf %102, %101 : vector<2x16x128xf32>
    %104 = arith.divf %102, %103 : vector<2x16x128xf32>
    %105 = arith.mulf %97, %104 : vector<2x16x128xf32>
    %c0_47 = arith.constant 0 : index
    %c0_48 = arith.constant 0 : index
    %c0_49 = arith.constant 0 : index
    %106 = vector.load %arg10[%c0_47, %c0_48, %c0_49] : memref<2x128x32xf32, #tpu.memory_space<vmem>>, vector<1x128x32xf32>
    %107 = vector.shape_cast %106 : vector<1x128x32xf32> to vector<128x32xf32>
    %cst_50 = arith.constant dense<0.000000e+00> : vector<2x16x32xf32>
    %108 = tpu.matmul %105, %107, %cst_50 {dimension_numbers = #tpu.dot_dimension_numbers<[2], [0], [0, 1], [1], [0, 0, 0, 1, 1, 1], [], []>} : vector<2x16x128xf32>, vector<128x32xf32>, vector<2x16x32xf32> -> vector<2x16x32xf32>
    %109 = arith.addf %61, %108 : vector<2x16x32xf32>
    %c0_51 = arith.constant 0 : index
    %c0_52 = arith.constant 0 : index
    %c0_53 = arith.constant 0 : index
    %110 = vector.load %arg11[%c0_51, %c0_52, %c0_53] : memref<2x1x32xf32, #tpu.memory_space<vmem>>, vector<1x1x32xf32>
    %111 = vector.shape_cast %110 : vector<1x1x32xf32> to vector<1x32xf32>
    %112 = vector.shape_cast %111 : vector<1x32xf32> to vector<1x1x32xf32>
    %113 = vector.broadcast %112 : vector<1x1x32xf32> to vector<2x16x32xf32>
    %114 = arith.addf %109, %113 : vector<2x16x32xf32>
    %c1 = arith.constant 1 : index
    %c0_54 = arith.constant 0 : index
    %c0_55 = arith.constant 0 : index
    %115 = vector.load %arg2[%c1, %c0_54, %c0_55] : memref<2x1x32xf32, #tpu.memory_space<vmem>>, vector<1x1x32xf32>
    %116 = vector.shape_cast %115 : vector<1x1x32xf32> to vector<1x32xf32>
    %c1_56 = arith.constant 1 : index
    %c0_57 = arith.constant 0 : index
    %c0_58 = arith.constant 0 : index
    %117 = vector.load %arg3[%c1_56, %c0_57, %c0_58] : memref<2x1x32xf32, #tpu.memory_space<vmem>>, vector<1x1x32xf32>
    %118 = vector.shape_cast %117 : vector<1x1x32xf32> to vector<1x32xf32>
    %cst_59 = arith.constant dense<0.000000e+00> : vector<2x16xf32>
    %119 = vector.multi_reduction <add>, %114, %cst_59 [2] : vector<2x16x32xf32> to vector<2x16xf32>
    %120 = vector.shape_cast %119 : vector<2x16xf32> to vector<2x16x1xf32>
    %cst_60 = arith.constant 3.200000e+01 : f32
    %121 = vector.broadcast %cst_60 : f32 to vector<2x16x1xf32>
    %122 = arith.divf %120, %121 : vector<2x16x1xf32>
    %123 = vector.broadcast %122 : vector<2x16x1xf32> to vector<2x16x32xf32>
    %124 = arith.subf %114, %123 : vector<2x16x32xf32>
    %125 = arith.mulf %124, %124 : vector<2x16x32xf32>
    %cst_61 = arith.constant dense<0.000000e+00> : vector<2x16xf32>
    %126 = vector.multi_reduction <add>, %125, %cst_61 [2] : vector<2x16x32xf32> to vector<2x16xf32>
    %127 = vector.shape_cast %126 : vector<2x16xf32> to vector<2x16x1xf32>
    %cst_62 = arith.constant 3.200000e+01 : f32
    %128 = vector.broadcast %cst_62 : f32 to vector<2x16x1xf32>
    %129 = arith.divf %127, %128 : vector<2x16x1xf32>
    %130 = vector.broadcast %122 : vector<2x16x1xf32> to vector<2x16x32xf32>
    %131 = arith.subf %114, %130 : vector<2x16x32xf32>
    %cst_63 = arith.constant 9.99999974E-6 : f32
    %132 = vector.broadcast %cst_63 : f32 to vector<2x16x1xf32>
    %133 = arith.addf %129, %132 : vector<2x16x1xf32>
    %134 = math.rsqrt %133 : vector<2x16x1xf32>
    %135 = vector.broadcast %134 : vector<2x16x1xf32> to vector<2x16x32xf32>
    %136 = arith.mulf %131, %135 : vector<2x16x32xf32>
    %137 = vector.shape_cast %116 : vector<1x32xf32> to vector<1x1x32xf32>
    %138 = vector.broadcast %137 : vector<1x1x32xf32> to vector<2x16x32xf32>
    %139 = arith.mulf %136, %138 : vector<2x16x32xf32>
    %140 = vector.shape_cast %118 : vector<1x32xf32> to vector<1x1x32xf32>
    %141 = vector.broadcast %140 : vector<1x1x32xf32> to vector<2x16x32xf32>
    %142 = arith.addf %139, %141 : vector<2x16x32xf32>
    %c1_64 = arith.constant 1 : index
    %c0_65 = arith.constant 0 : index
    %c0_66 = arith.constant 0 : index
    %143 = vector.load %arg4[%c1_64, %c0_65, %c0_66] : memref<2x32x96xf32, #tpu.memory_space<vmem>>, vector<1x32x96xf32>
    %144 = vector.shape_cast %143 : vector<1x32x96xf32> to vector<32x96xf32>
    %cst_67 = arith.constant dense<0.000000e+00> : vector<2x16x96xf32>
    %145 = tpu.matmul %142, %144, %cst_67 {dimension_numbers = #tpu.dot_dimension_numbers<[2], [0], [0, 1], [1], [0, 0, 0, 1, 1, 1], [], []>} : vector<2x16x32xf32>, vector<32x96xf32>, vector<2x16x96xf32> -> vector<2x16x96xf32>
    %146 = vector.extract_strided_slice %145 {offsets = [0, 0, 0], sizes = [2, 16, 32], strides = [1, 1, 1]} : vector<2x16x96xf32> to vector<2x16x32xf32>
    %147 = vector.extract_strided_slice %145 {offsets = [0, 0, 32], sizes = [2, 16, 32], strides = [1, 1, 1]} : vector<2x16x96xf32> to vector<2x16x32xf32>
    %148 = vector.extract_strided_slice %145 {offsets = [0, 0, 64], sizes = [2, 16, 32], strides = [1, 1, 1]} : vector<2x16x96xf32> to vector<2x16x32xf32>
    "tpu.trace_start"() <{level = 10 : i32, message = "bqd,bkd->bqk"}> : () -> ()
    %cst_68 = arith.constant dense<0.000000e+00> : vector<2x16x16xf32>
    %149 = tpu.matmul %146, %147, %cst_68 {dimension_numbers = #tpu.dot_dimension_numbers<[2], [2], [1], [1], [0, 0, 0, 1, 1, 1], [0], [0]>} : vector<2x16x32xf32>, vector<2x16x32xf32>, vector<2x16x16xf32> -> vector<2x16x16xf32>
    "tpu.trace_stop"() : () -> ()
    %150 = vector.broadcast %5 : f32 to vector<2x16x16xf32>
    %151 = arith.mulf %149, %150 : vector<2x16x16xf32>
    %cst_69 = arith.constant -1.000000e+09 : f32
    %152 = vector.shape_cast %3 : vector<16x16xi1> to vector<1x16x16xi1>
    %153 = vector.broadcast %152 : vector<1x16x16xi1> to vector<2x16x16xi1>
    %154 = vector.broadcast %cst_69 : f32 to vector<2x16x16xf32>
    %155 = arith.select %153, %151, %154 : vector<2x16x16xi1>, vector<2x16x16xf32>
    %cst_70 = arith.constant dense<0xFF800000> : vector<2x16xf32>
    %156 = vector.multi_reduction <maximumf>, %155, %cst_70 [2] : vector<2x16x16xf32> to vector<2x16xf32>
    %157 = vector.shape_cast %156 : vector<2x16xf32> to vector<2x16x1xf32>
    %158 = vector.broadcast %157 : vector<2x16x1xf32> to vector<2x16x16xf32>
    %159 = arith.subf %155, %158 : vector<2x16x16xf32>
    %160 = math.exp %159 : vector<2x16x16xf32>
    %cst_71 = arith.constant dense<0.000000e+00> : vector<2x16xf32>
    %161 = vector.multi_reduction <add>, %160, %cst_71 [2] : vector<2x16x16xf32> to vector<2x16xf32>
    %162 = vector.shape_cast %161 : vector<2x16xf32> to vector<2x16x1xf32>
    %163 = tpu.reciprocal %162 {approx = true} : vector<2x16x1xf32> -> vector<2x16x1xf32>
    %164 = vector.broadcast %163 : vector<2x16x1xf32> to vector<2x16x16xf32>
    %165 = arith.mulf %160, %164 : vector<2x16x16xf32>
    "tpu.trace_start"() <{level = 10 : i32, message = "bqk,bkd->bqd"}> : () -> ()
    %cst_72 = arith.constant dense<0.000000e+00> : vector<2x16x32xf32>
    %166 = tpu.matmul %165, %148, %cst_72 {dimension_numbers = #tpu.dot_dimension_numbers<[2], [1], [1], [2], [0, 0, 0, 1, 1, 2], [0], [0]>} : vector<2x16x16xf32>, vector<2x16x32xf32>, vector<2x16x32xf32> -> vector<2x16x32xf32>
    "tpu.trace_stop"() : () -> ()
    %c1_73 = arith.constant 1 : index
    %c0_74 = arith.constant 0 : index
    %c0_75 = arith.constant 0 : index
    %167 = vector.load %arg5[%c1_73, %c0_74, %c0_75] : memref<2x32x32xf32, #tpu.memory_space<vmem>>, vector<1x32x32xf32>
    %168 = vector.shape_cast %167 : vector<1x32x32xf32> to vector<32x32xf32>
    %cst_76 = arith.constant dense<0.000000e+00> : vector<2x16x32xf32>
    %169 = tpu.matmul %166, %168, %cst_76 {dimension_numbers = #tpu.dot_dimension_numbers<[2], [0], [0, 1], [1], [0, 0, 0, 1, 1, 1], [], []>} : vector<2x16x32xf32>, vector<32x32xf32>, vector<2x16x32xf32> -> vector<2x16x32xf32>
    %170 = arith.addf %114, %169 : vector<2x16x32xf32>
    %c1_77 = arith.constant 1 : index
    %c0_78 = arith.constant 0 : index
    %c0_79 = arith.constant 0 : index
    %171 = vector.load %arg6[%c1_77, %c0_78, %c0_79] : memref<2x1x32xf32, #tpu.memory_space<vmem>>, vector<1x1x32xf32>
    %172 = vector.shape_cast %171 : vector<1x1x32xf32> to vector<1x32xf32>
    %c1_80 = arith.constant 1 : index
    %c0_81 = arith.constant 0 : index
    %c0_82 = arith.constant 0 : index
    %173 = vector.load %arg7[%c1_80, %c0_81, %c0_82] : memref<2x1x32xf32, #tpu.memory_space<vmem>>, vector<1x1x32xf32>
    %174 = vector.shape_cast %173 : vector<1x1x32xf32> to vector<1x32xf32>
    %cst_83 = arith.constant dense<0.000000e+00> : vector<2x16xf32>
    %175 = vector.multi_reduction <add>, %170, %cst_83 [2] : vector<2x16x32xf32> to vector<2x16xf32>
    %176 = vector.shape_cast %175 : vector<2x16xf32> to vector<2x16x1xf32>
    %cst_84 = arith.constant 3.200000e+01 : f32
    %177 = vector.broadcast %cst_84 : f32 to vector<2x16x1xf32>
    %178 = arith.divf %176, %177 : vector<2x16x1xf32>
    %179 = vector.broadcast %178 : vector<2x16x1xf32> to vector<2x16x32xf32>
    %180 = arith.subf %170, %179 : vector<2x16x32xf32>
    %181 = arith.mulf %180, %180 : vector<2x16x32xf32>
    %cst_85 = arith.constant dense<0.000000e+00> : vector<2x16xf32>
    %182 = vector.multi_reduction <add>, %181, %cst_85 [2] : vector<2x16x32xf32> to vector<2x16xf32>
    %183 = vector.shape_cast %182 : vector<2x16xf32> to vector<2x16x1xf32>
    %cst_86 = arith.constant 3.200000e+01 : f32
    %184 = vector.broadcast %cst_86 : f32 to vector<2x16x1xf32>
    %185 = arith.divf %183, %184 : vector<2x16x1xf32>
    %186 = vector.broadcast %178 : vector<2x16x1xf32> to vector<2x16x32xf32>
    %187 = arith.subf %170, %186 : vector<2x16x32xf32>
    %cst_87 = arith.constant 9.99999974E-6 : f32
    %188 = vector.broadcast %cst_87 : f32 to vector<2x16x1xf32>
    %189 = arith.addf %185, %188 : vector<2x16x1xf32>
    %190 = math.rsqrt %189 : vector<2x16x1xf32>
    %191 = vector.broadcast %190 : vector<2x16x1xf32> to vector<2x16x32xf32>
    %192 = arith.mulf %187, %191 : vector<2x16x32xf32>
    %193 = vector.shape_cast %172 : vector<1x32xf32> to vector<1x1x32xf32>
    %194 = vector.broadcast %193 : vector<1x1x32xf32> to vector<2x16x32xf32>
    %195 = arith.mulf %192, %194 : vector<2x16x32xf32>
    %196 = vector.shape_cast %174 : vector<1x32xf32> to vector<1x1x32xf32>
    %197 = vector.broadcast %196 : vector<1x1x32xf32> to vector<2x16x32xf32>
    %198 = arith.addf %195, %197 : vector<2x16x32xf32>
    %c1_88 = arith.constant 1 : index
    %c0_89 = arith.constant 0 : index
    %c0_90 = arith.constant 0 : index
    %199 = vector.load %arg8[%c1_88, %c0_89, %c0_90] : memref<2x32x128xf32, #tpu.memory_space<vmem>>, vector<1x32x128xf32>
    %200 = vector.shape_cast %199 : vector<1x32x128xf32> to vector<32x128xf32>
    %cst_91 = arith.constant dense<0.000000e+00> : vector<2x16x128xf32>
    %201 = tpu.matmul %198, %200, %cst_91 {dimension_numbers = #tpu.dot_dimension_numbers<[2], [0], [0, 1], [1], [0, 0, 0, 1, 1, 1], [], []>} : vector<2x16x32xf32>, vector<32x128xf32>, vector<2x16x128xf32> -> vector<2x16x128xf32>
    %c1_92 = arith.constant 1 : index
    %c0_93 = arith.constant 0 : index
    %c0_94 = arith.constant 0 : index
    %202 = vector.load %arg9[%c1_92, %c0_93, %c0_94] : memref<2x1x128xf32, #tpu.memory_space<vmem>>, vector<1x1x128xf32>
    %203 = vector.shape_cast %202 : vector<1x1x128xf32> to vector<1x128xf32>
    %204 = vector.shape_cast %203 : vector<1x128xf32> to vector<1x1x128xf32>
    %205 = vector.broadcast %204 : vector<1x1x128xf32> to vector<2x16x128xf32>
    %206 = arith.addf %201, %205 : vector<2x16x128xf32>
    %cst_95 = arith.constant 1.702000e+00 : f32
    %207 = vector.broadcast %cst_95 : f32 to vector<2x16x128xf32>
    %208 = arith.mulf %207, %206 : vector<2x16x128xf32>
    %209 = arith.negf %208 : vector<2x16x128xf32>
    %210 = math.exp %209 : vector<2x16x128xf32>
    %cst_96 = arith.constant 1.000000e+00 : f32
    %211 = vector.broadcast %cst_96 : f32 to vector<2x16x128xf32>
    %212 = arith.addf %211, %210 : vector<2x16x128xf32>
    %213 = arith.divf %211, %212 : vector<2x16x128xf32>
    %214 = arith.mulf %206, %213 : vector<2x16x128xf32>
    %c1_97 = arith.constant 1 : index
    %c0_98 = arith.constant 0 : index
    %c0_99 = arith.constant 0 : index
    %215 = vector.load %arg10[%c1_97, %c0_98, %c0_99] : memref<2x128x32xf32, #tpu.memory_space<vmem>>, vector<1x128x32xf32>
    %216 = vector.shape_cast %215 : vector<1x128x32xf32> to vector<128x32xf32>
    %cst_100 = arith.constant dense<0.000000e+00> : vector<2x16x32xf32>
    %217 = tpu.matmul %214, %216, %cst_100 {dimension_numbers = #tpu.dot_dimension_numbers<[2], [0], [0, 1], [1], [0, 0, 0, 1, 1, 1], [], []>} : vector<2x16x128xf32>, vector<128x32xf32>, vector<2x16x32xf32> -> vector<2x16x32xf32>
    %218 = arith.addf %170, %217 : vector<2x16x32xf32>
    %c1_101 = arith.constant 1 : index
    %c0_102 = arith.constant 0 : index
    %c0_103 = arith.constant 0 : index
    %219 = vector.load %arg11[%c1_101, %c0_102, %c0_103] : memref<2x1x32xf32, #tpu.memory_space<vmem>>, vector<1x1x32xf32>
    %220 = vector.shape_cast %219 : vector<1x1x32xf32> to vector<1x32xf32>
    %221 = vector.shape_cast %220 : vector<1x32xf32> to vector<1x1x32xf32>
    %222 = vector.broadcast %221 : vector<1x1x32xf32> to vector<2x16x32xf32>
    %223 = arith.addf %218, %222 : vector<2x16x32xf32>
    %c0_104 = arith.constant 0 : index
    %c0_105 = arith.constant 0 : index
    %224 = vector.load %arg12[%c0_104, %c0_105] : memref<1x32xf32, #tpu.memory_space<vmem>>, vector<1x32xf32>
    %c0_106 = arith.constant 0 : index
    %c0_107 = arith.constant 0 : index
    %225 = vector.load %arg13[%c0_106, %c0_107] : memref<1x32xf32, #tpu.memory_space<vmem>>, vector<1x32xf32>
    %cst_108 = arith.constant dense<0.000000e+00> : vector<2x16xf32>
    %226 = vector.multi_reduction <add>, %223, %cst_108 [2] : vector<2x16x32xf32> to vector<2x16xf32>
    %227 = vector.shape_cast %226 : vector<2x16xf32> to vector<2x16x1xf32>
    %cst_109 = arith.constant 3.200000e+01 : f32
    %228 = vector.broadcast %cst_109 : f32 to vector<2x16x1xf32>
    %229 = arith.divf %227, %228 : vector<2x16x1xf32>
    %230 = vector.broadcast %229 : vector<2x16x1xf32> to vector<2x16x32xf32>
    %231 = arith.subf %223, %230 : vector<2x16x32xf32>
    %232 = arith.mulf %231, %231 : vector<2x16x32xf32>
    %cst_110 = arith.constant dense<0.000000e+00> : vector<2x16xf32>
    %233 = vector.multi_reduction <add>, %232, %cst_110 [2] : vector<2x16x32xf32> to vector<2x16xf32>
    %234 = vector.shape_cast %233 : vector<2x16xf32> to vector<2x16x1xf32>
    %cst_111 = arith.constant 3.200000e+01 : f32
    %235 = vector.broadcast %cst_111 : f32 to vector<2x16x1xf32>
    %236 = arith.divf %234, %235 : vector<2x16x1xf32>
    %237 = vector.broadcast %229 : vector<2x16x1xf32> to vector<2x16x32xf32>
    %238 = arith.subf %223, %237 : vector<2x16x32xf32>
    %cst_112 = arith.constant 9.99999974E-6 : f32
    %239 = vector.broadcast %cst_112 : f32 to vector<2x16x1xf32>
    %240 = arith.addf %236, %239 : vector<2x16x1xf32>
    %241 = math.rsqrt %240 : vector<2x16x1xf32>
    %242 = vector.broadcast %241 : vector<2x16x1xf32> to vector<2x16x32xf32>
    %243 = arith.mulf %238, %242 : vector<2x16x32xf32>
    %244 = vector.shape_cast %224 : vector<1x32xf32> to vector<1x1x32xf32>
    %245 = vector.broadcast %244 : vector<1x1x32xf32> to vector<2x16x32xf32>
    %246 = arith.mulf %243, %245 : vector<2x16x32xf32>
    %247 = vector.shape_cast %225 : vector<1x32xf32> to vector<1x1x32xf32>
    %248 = vector.broadcast %247 : vector<1x1x32xf32> to vector<2x16x32xf32>
    %249 = arith.addf %246, %248 : vector<2x16x32xf32>
    %250 = vector.extract_strided_slice %249 {offsets = [0, 0, 0], sizes = [1, 16, 32], strides = [1, 1, 1]} : vector<2x16x32xf32> to vector<1x16x32xf32>
    %251 = vector.shape_cast %250 : vector<1x16x32xf32> to vector<16x32xf32>
    %252 = vector.extract_strided_slice %249 {offsets = [1, 0, 0], sizes = [1, 16, 32], strides = [1, 1, 1]} : vector<2x16x32xf32> to vector<1x16x32xf32>
    %253 = vector.shape_cast %252 : vector<1x16x32xf32> to vector<16x32xf32>
    %254 = tpu.concatenate %251, %253 in 0 : vector<16x32xf32>, vector<16x32xf32> -> vector<32x32xf32>
    %c0_113 = arith.constant 0 : index
    %c0_114 = arith.constant 0 : index
    %255 = vector.load %arg17[%c0_113, %c0_114] : memref<32x64xf32, #tpu.memory_space<vmem>>, vector<32x64xf32>
    %cst_115 = arith.constant dense<0.000000e+00> : vector<32x64xf32>
    %256 = tpu.matmul %254, %255, %cst_115 {dimension_numbers = #tpu.dot_dimension_numbers<[1], [0], [0], [1], [0, 0, 1, 1], [], []>} : vector<32x32xf32>, vector<32x64xf32>, vector<32x64xf32> -> vector<32x64xf32>
    %257 = vector.extract_strided_slice %256 {offsets = [0, 0], sizes = [32, 32], strides = [1, 1]} : vector<32x64xf32> to vector<32x32xf32>
    %258 = vector.extract_strided_slice %256 {offsets = [0, 32], sizes = [32, 32], strides = [1, 1]} : vector<32x64xf32> to vector<32x32xf32>
    %c0_116 = arith.constant 0 : index
    %c0_117 = arith.constant 0 : index
    %259 = vector.load %arg16[%c0_116, %c0_117] : memref<32x4xf32, #tpu.memory_space<vmem>>, vector<32x4xf32>
    %cst_118 = arith.constant dense<0.000000e+00> : vector<32x4xf32>
    %260 = tpu.matmul %257, %259, %cst_118 {dimension_numbers = #tpu.dot_dimension_numbers<[1], [0], [0], [1], [0, 0, 1, 1], [], []>} : vector<32x32xf32>, vector<32x4xf32>, vector<32x4xf32> -> vector<32x4xf32>
    %261 = vector.broadcast %5 : f32 to vector<32x4xf32>
    %262 = arith.mulf %260, %261 : vector<32x4xf32>
    %c0_119 = arith.constant 0 : index
    %c0_120 = arith.constant 0 : index
    %263 = memref.load %arg0[%c0_119, %c0_120] : memref<4x8xf32, #tpu.memory_space<smem>>
    %264 = tpu.iota {dimensions = array<i32: 1>} : vector<1x32xi32>
    %c16_i32 = arith.constant 16 : i32
    %265 = vector.broadcast %c16_i32 : i32 to vector<1x32xi32>
    %266 = arith.cmpi slt, %264, %265 : vector<1x32xi32>
    %cst_121 = arith.constant 1.000000e+00 : f32
    %267 = arith.subf %cst_121, %263 : f32
    %268 = vector.broadcast %263 : f32 to vector<1x32xf32>
    %269 = vector.broadcast %267 : f32 to vector<1x32xf32>
    %270 = arith.select %266, %268, %269 : vector<1x32xi1>, vector<1x32xf32>
    %c0_122 = arith.constant 0 : index
    %c0_123 = arith.constant 0 : index
    %271 = vector.load %arg18[%c0_122, %c0_123] : memref<32x4xf32, #tpu.memory_space<vmem>>, vector<32x4xf32>
    %cst_124 = arith.constant dense<0.000000e+00> : vector<32x4xf32>
    %272 = tpu.matmul %258, %271, %cst_124 {dimension_numbers = #tpu.dot_dimension_numbers<[1], [0], [0], [1], [0, 0, 1, 1], [], []>} : vector<32x32xf32>, vector<32x4xf32>, vector<32x4xf32> -> vector<32x4xf32>
    %273 = tpu.transpose %272, [1, 0] : vector<32x4xf32> -> vector<4x32xf32>
    %274 = vector.broadcast %270 : vector<1x32xf32> to vector<4x32xf32>
    %275 = arith.mulf %273, %274 : vector<4x32xf32>
    %c0_125 = arith.constant 0 : index
    %c0_126 = arith.constant 0 : index
    %276 = vector.load %arg14[%c0_125, %c0_126] : memref<4x256xf32, #tpu.memory_space<vmem>>, vector<4x256xf32>
    %c0_i32 = arith.constant 0 : i32
    %c4_i32 = arith.constant 4 : i32
    %277 = arith.addi %c0_i32, %c4_i32 : i32
    %c1_i32 = arith.constant 1 : i32
    %278 = scf.for %arg22 = %c0_i32 to %277 step %c1_i32 iter_args(%arg23 = %276) -> (vector<4x256xf32>)  : i32 {
      %290 = arith.index_cast %arg22 : i32 to index
      %c1_137 = arith.constant 1 : index
      %291 = memref.load %arg0[%290, %c1_137] : memref<4x8xf32, #tpu.memory_space<smem>>
      %292 = arith.index_cast %arg22 : i32 to index
      %c2 = arith.constant 2 : index
      %293 = memref.load %arg0[%292, %c2] : memref<4x8xf32, #tpu.memory_space<smem>>
      %294 = arith.index_cast %arg22 : i32 to index
      %c0_138 = arith.constant 0 : index
      %c0_139 = arith.constant 0 : index
      %295 = vector.load %arg15[%294, %c0_138, %c0_139] : memref<4x4x1xf32, #tpu.memory_space<vmem>>, vector<1x4x1xf32>
      %296 = vector.shape_cast %295 : vector<1x4x1xf32> to vector<4x1xf32>
      %cst_140 = arith.constant dense<0.000000e+00> : vector<32x256xf32>
      %297 = tpu.matmul %262, %arg23, %cst_140 {dimension_numbers = #tpu.dot_dimension_numbers<[1], [0], [0], [1], [0, 0, 1, 1], [], []>} : vector<32x4xf32>, vector<4x256xf32>, vector<32x256xf32> -> vector<32x256xf32>
      %298 = vector.extract_strided_slice %297 {offsets = [0, 0], sizes = [16, 256], strides = [1, 1]} : vector<32x256xf32> to vector<16x256xf32>
      %299 = vector.extract_strided_slice %297 {offsets = [16, 0], sizes = [16, 256], strides = [1, 1]} : vector<32x256xf32> to vector<16x256xf32>
      %cst_141 = arith.constant dense<0xFF800000> : vector<256xf32>
      %300 = vector.multi_reduction <maximumf>, %298, %cst_141 [0] : vector<16x256xf32> to vector<256xf32>
      %301 = vector.shape_cast %300 : vector<256xf32> to vector<1x256xf32>
      %302 = vector.broadcast %301 : vector<1x256xf32> to vector<16x256xf32>
      %303 = arith.subf %298, %302 : vector<16x256xf32>
      %304 = math.exp %303 : vector<16x256xf32>
      %cst_142 = arith.constant dense<0.000000e+00> : vector<256xf32>
      %305 = vector.multi_reduction <add>, %304, %cst_142 [0] : vector<16x256xf32> to vector<256xf32>
      %306 = vector.shape_cast %305 : vector<256xf32> to vector<1x256xf32>
      %307 = tpu.reciprocal %306 {approx = true} : vector<1x256xf32> -> vector<1x256xf32>
      %308 = vector.broadcast %307 : vector<1x256xf32> to vector<16x256xf32>
      %309 = arith.mulf %304, %308 : vector<16x256xf32>
      %cst_143 = arith.constant dense<0xFF800000> : vector<256xf32>
      %310 = vector.multi_reduction <maximumf>, %299, %cst_143 [0] : vector<16x256xf32> to vector<256xf32>
      %311 = vector.shape_cast %310 : vector<256xf32> to vector<1x256xf32>
      %312 = vector.broadcast %311 : vector<1x256xf32> to vector<16x256xf32>
      %313 = arith.subf %299, %312 : vector<16x256xf32>
      %314 = math.exp %313 : vector<16x256xf32>
      %cst_144 = arith.constant dense<0.000000e+00> : vector<256xf32>
      %315 = vector.multi_reduction <add>, %314, %cst_144 [0] : vector<16x256xf32> to vector<256xf32>
      %316 = vector.shape_cast %315 : vector<256xf32> to vector<1x256xf32>
      %317 = tpu.reciprocal %316 {approx = true} : vector<1x256xf32> -> vector<1x256xf32>
      %318 = vector.broadcast %317 : vector<1x256xf32> to vector<16x256xf32>
      %319 = arith.mulf %314, %318 : vector<16x256xf32>
      %320 = tpu.concatenate %309, %319 in 0 : vector<16x256xf32>, vector<16x256xf32> -> vector<32x256xf32>
      %cst_145 = arith.constant dense<0.000000e+00> : vector<4x256xf32>
      %321 = tpu.matmul %275, %320, %cst_145 {dimension_numbers = #tpu.dot_dimension_numbers<[1], [0], [0], [1], [0, 0, 1, 1], [], []>} : vector<4x32xf32>, vector<32x256xf32>, vector<4x256xf32> -> vector<4x256xf32>
      %322 = vector.broadcast %296 : vector<4x1xf32> to vector<4x256xf32>
      %323 = arith.addf %321, %322 : vector<4x256xf32>
      %324 = vector.broadcast %291 : f32 to vector<4x256xf32>
      %325 = arith.mulf %324, %arg23 : vector<4x256xf32>
      %326 = vector.broadcast %293 : f32 to vector<4x256xf32>
      %327 = arith.mulf %326, %323 : vector<4x256xf32>
      %328 = arith.addf %325, %327 : vector<4x256xf32>
      scf.yield %328 : vector<4x256xf32>
    }
    %c4_i32_127 = arith.constant 4 : i32
    %c0_128 = arith.constant 0 : index
    %c0_129 = arith.constant 0 : index
    %279 = vector.load %arg19[%c0_128, %c0_129] : memref<3x4xf32, #tpu.memory_space<vmem>>, vector<3x4xf32>
    %cst_130 = arith.constant dense<0.000000e+00> : vector<3x256xf32>
    %280 = tpu.matmul %279, %278, %cst_130 {dimension_numbers = #tpu.dot_dimension_numbers<[1], [0], [0], [1], [0, 0, 1, 1], [], []>} : vector<3x4xf32>, vector<4x256xf32>, vector<3x256xf32> -> vector<3x256xf32>
    %c0_131 = arith.constant 0 : index
    %c0_132 = arith.constant 0 : index
    %281 = vector.load %arg20[%c0_131, %c0_132] : memref<3x1xf32, #tpu.memory_space<vmem>>, vector<3x1xf32>
    %282 = vector.broadcast %281 : vector<3x1xf32> to vector<3x256xf32>
    %283 = arith.addf %280, %282 : vector<3x256xf32>
    %284 = math.tanh %283 : vector<3x256xf32>
    %cst_133 = arith.constant 1.000000e+00 : f32
    %285 = vector.broadcast %cst_133 : f32 to vector<3x256xf32>
    %286 = arith.addf %284, %285 : vector<3x256xf32>
    %cst_134 = arith.constant 5.000000e-01 : f32
    %287 = vector.broadcast %cst_134 : f32 to vector<3x256xf32>
    %288 = arith.mulf %286, %287 : vector<3x256xf32>
    %c0_135 = arith.constant 0 : index
    %c0_136 = arith.constant 0 : index
    %289 = vector.load %arg21[%c0_135, %c0_136] : memref<3x256xf32, #tpu.memory_space<vmem>>, vector<3x256xf32>
    tpu.vector_store %arg21[%c0_135, %c0_136], %288 {strides = array<i32>} : memref<3x256xf32, #tpu.memory_space<vmem>>, vector<3x256xf32>,
    return
  }
}

</mosaic_0001>

<bundles_post_ra>
// kernel: adaface_forward.1
= control target key start
LH: loop header
LB: loop body
LE: loop exit
PB: predicated region body
PF: predicated region fallthrough
CT: control target
= control target key end

     0   :  { %s4636_s0 = inlined_call_operand.vmem [shape: f32[4,8], index: 0, kind: input, shape index: {}]   ;;  %s4637_s1 = inlined_call_operand.vmem [shape: f32[2,16,32], index: 1, kind: input, shape index: {}]   ;;  %s4638_s2 = inlined_call_operand.vmem [shape: f32[2,1,32], index: 2, kind: input, shape index: {}]   ;;  %s4639_s3 = inlined_call_operand.vmem [shape: f32[2,1,32], index: 3, kind: input, shape index: {}]   ;;  %s4640_s4 = inlined_call_operand.vmem [shape: f32[2,32,96], index: 4, kind: input, shape index: {}]   ;;  %s4641_s5 = inlined_call_operand.vmem [shape: f32[2,32,32], index: 5, kind: input, shape index: {}]   ;;  %s4642_s6 = inlined_call_operand.vmem [shape: f32[2,1,32], index: 6, kind: input, shape index: {}]   ;;  %s4643_s7 = inlined_call_operand.vmem [shape: f32[2,1,32], index: 7, kind: input, shape index: {}]   ;;  %s4644_s8 = inlined_call_operand.vmem [shape: f32[2,32,128], index: 8, kind: input, shape index: {}]   ;;  %s4645_s9 = inlined_call_operand.vmem [shape: f32[2,1,128], index: 9, kind: input, shape index: {}]   ;;  %s4646_s10 = inlined_call_operand.vmem [shape: f32[2,128,32], index: 10, kind: input, shape index: {}]   ;;  %s4647_s11 = inlined_call_operand.vmem [shape: f32[2,1,32], index: 11, kind: input, shape index: {}]   ;;  %s4648_s12 = inlined_call_operand.vmem [shape: f32[1,32], index: 12, kind: input, shape index: {}]   ;;  %s4649_s13 = inlined_call_operand.vmem [shape: f32[1,32], index: 13, kind: input, shape index: {}]   ;;  %s4650_s14 = inlined_call_operand.vmem [shape: f32[4,256], index: 14, kind: input, shape index: {}]   ;;  %s4651_s15 = inlined_call_operand.vmem [shape: f32[4,4,1], index: 15, kind: input, shape index: {}]   ;;  %s4652_s16 = inlined_call_operand.vmem [shape: f32[32,4], index: 16, kind: input, shape index: {}]   ;;  %s4653_s17 = inlined_call_operand.vmem [shape: f32[32,64], index: 17, kind: input, shape index: {}]   ;;  %s4654_s18 = inlined_call_operand.vmem [shape: f32[32,4], index: 18, kind: input, shape index: {}]   ;;  %s4655_s19 = inlined_call_operand.vmem [shape: f32[3,4], index: 19, kind: input, shape index: {}]   ;;  %s4656_s20 = inlined_call_operand.vmem [shape: f32[3,1], index: 20, kind: input, shape index: {}]   ;;  %s4657_s21 = inlined_call_operand.vmem [shape: f32[3,256], index: 21, kind: output, shape index: {}]  }
   0x1   :  { %4663 = sst [smem:[#allocation5_spill]] %s4636_s0 }
   0x2   :  { %4664 = sst [smem:[#allocation6_spill]] %s4637_s1 }
   0x3   :  { %4665 = sst [smem:[#allocation7_spill]] %s4638_s2 }
   0x4   :  { %4666 = sst [smem:[#allocation8_spill]] %s4639_s3 }
   0x5   :  { %4667 = sst [smem:[#allocation9_spill]] %s4640_s4 }
   0x6   :  { %4668 = sst [smem:[#allocation10_spill]] %s4641_s5 }
   0x7   :  { %26 = vsyncpa [#allocation3], 0  ;;  %s4669_s26 = sld [smem:[#allocation5_spill]] }
   0xd   :  { %s33_s27 = sshll.u32 %s4669_s26, 4  ;;  %s34_s27 = int_to_ptr.vmem [resolvable:$true] %s33_s27 }
   0xe   :  { %s3893_s3 = scalar_lea.vmem %s34_s27, 64  ;;  %p3898_p1 = scmp.lt.s32.totalorder %s34_s27, %s34_s27 }
   0xf   :  { %p3894_p0 = scmp.ne.s32.totalorder %s34_s27, %s3893_s3  ;;  %p3899_p2 = scmp.lt.s32.totalorder %s3893_s3, %s3893_s3 }
  0x11   :  { %p3900_p3 = por %p3899_p2, %p3898_p1 }
  0x13   :  { %p3901_p4 = pnand %p3900_p3, %p3894_p0 }
  0x15   :  { %3904 = shalt.err (!%p3901_p4)
}
  0x16   :  { %s3923_s28 = smov [#allocation2]  }
  0x17   :  { %36 = dma.vmem_to_smem %s34_s27, 64, %s3923_s28, [#allocation3]  }
  0x18   :  { %3913 = dma.done.wait [#allocation3], 64  }
  0x19   :  { %3914 = vsyncadd [#allocation3], 4294967232 }
  0x1a   :  { %80 = sfence }
  0x1b   :  { %s4670_s4 = sld [smem:[#allocation6_spill]]  ;;  %vm94_vm0 = vcmask 261120   ;;  %s4671_s26 = sld [smem:[#allocation9_spill]]  ;;  %vm459_vm3 = vcmask 130048  }
  0x1c   :  { %s4672_s22 = sld [smem:[#allocation7_spill]]  ;;  %s4673_s24 = sld [smem:[#allocation8_spill]]  ;;  %vm4113_vm1 = vmpackc.low %vm94_vm0, %vm94_vm0 }
  0x1d   :  { %s3924_s2 = smov 96   ;;  %s3925_s25 = smov 64  }
  0x1e   :  { %s4676_s28 = sld [smem:[#allocation10_spill]]  ;;  %s2417_s1 = sld [smem:[#allocation2]] }
  0x21   :  { %v4046_v0 = vld [vmem:[%s4670_s4] sm:$0xff]  ;;  %v4051_v1 = vld [vmem:[%s4670_s4 + $0x10] sm:$0xff]  ;;  %v4056_v2 = vld [vmem:[%s4670_s4 + $0x8] sm:$0xff] }
  0x22   :  { %v95_v3 = vsel %vm94_vm0, %v4046_v0, 0.0  ;;  %v101_v4 = vsel %vm94_vm0, %v4051_v1, 0.0  ;;  %v4065_v5 = vld [vmem:[%s4670_s4 + $0x18] sm:$0xff]  ;;  %v98_v6 = vsel %vm94_vm0, %v4056_v2, 0.0  ;;  %v168_v28 = vld [vmem:[%s4671_s26] sm:$0xff]  ;;  %v169_v29 = vld [vmem:[%s4671_s26 + $0x8] sm:$0xff] }
  0x23   :  { %96 = vadd.xlane.f32.xlu0 %v95_v3  ;;  %102 = vadd.xlane.f32.xlu1 %v101_v4  ;;  %v104_v7 = vsel %vm94_vm0, %v4065_v5, 0.0  ;;  %v170_v30 = vld [vmem:[%s4671_s26 + $0x10] sm:$0xff]  ;;  %v3512_v31 = vpack.c.bf16 %v169_v29, %v168_v28  ;;  %v171_v32 = vld [vmem:[%s4671_s26 + $0x18] sm:$0xff]  ;;  %v2982_v47 = vld [vmem:[%s4672_s22] ss:$0 sm:$0xff] }
  0x24   :  { %v3516_v33 = vpack.c.bf16 %v171_v32, %v170_v30  ;;  %v2983_v49 = vld [vmem:[%s4673_s24] ss:$0 sm:$0xff]  ;;  %s2419_s27 = ssub.f32 1.0, %s2417_s1 }
  0x25   :  { %3513 = vmatprep.subr.bf16.mxu0 %v3512_v31 }
  0x26   :  { %3515 = vmatpush3.bf16.msra.mxu0 %v3512_v31 }
  0x27   :  { %99 = vadd.xlane.f32.xlu0 %v98_v6  ;;  %105 = vadd.xlane.f32.xlu1 %v104_v7 }
  0x28   :  { %3517 = vmatprep.subr.bf16.mxu0 %v3516_v33 }
  0x2a   :  { %3519 = vmatpush3.bf16.msra.mxu0 %v3516_v33 }
  0xb0   :  { %v97_v8 = vpop.xlane.xlu0 %96  ;;  %v103_v9 = vpop.xlane.xlu1 %102 }
  0xb1   :  { %v108_v10 = vmul.f32 0.03125, %v97_v8  ;;  %v110_v11 = vmul.f32 0.03125, %v103_v9 }
  0xb3   :  { %v112_v12 = vsub.f32 %v4046_v0, %v108_v10  ;;  %v114_v13 = vsub.f32 %v4051_v1, %v110_v11 }
  0xb4   :  { %v100_v14 = vpop.xlane.xlu0 %99  ;;  %v106_v15 = vpop.xlane.xlu1 %105 }
  0xb5   :  { %v109_v16 = vmul.f32 0.03125, %v100_v14  ;;  %v111_v17 = vmul.f32 0.03125, %v106_v15  ;;  %v116_v18 = vmul.f32 %v112_v12, %v112_v12  ;;  %v118_v19 = vmul.f32 %v114_v13, %v114_v13 }
  0xb7   :  { %v113_v20 = vsub.f32 %v4056_v2, %v109_v16  ;;  %v115_v21 = vsub.f32 %v4065_v5, %v111_v17  ;;  %v120_v22 = vsel %vm94_vm0, %v116_v18, 0.0  ;;  %v126_v23 = vsel %vm94_vm0, %v118_v19, 0.0 }
  0xb8   :  { %121 = vadd.xlane.f32.xlu0 %v120_v22  ;;  %v85_v19 = vlaneseq }
  0xb9   :  { %v117_v24 = vmul.f32 %v113_v20, %v113_v20  ;;  %v119_v25 = vmul.f32 %v115_v21, %v115_v21 }
  0xba   :  { %v4132_v22 = vand.u32 127, %v85_v19 }
  0xbb   :  { %v123_v26 = vsel %vm94_vm0, %v117_v24, 0.0  ;;  %v129_v27 = vsel %vm94_vm0, %v119_v25, 0.0 }
  0xbc   :  { %127 = vadd.xlane.f32.xlu0 %v126_v23  ;;  %124 = vadd.xlane.f32.xlu1 %v123_v26  ;;  %vm2418_vm5 = vcmp.lt.s32.totalorder %v4132_v22, 16 }
  0xc0   :  { %130 = vadd.xlane.f32.xlu1 %v129_v27 }
 0x145   :  { %v122_v34 = vpop.xlane.xlu0 %121 }
 0x146   :  { %v132_v35 = vmul.f32 0.03125, %v122_v34 }
 0x148   :  { %v136_v36 = vadd.f32 1e-05, %v132_v35 }
 0x149   :  { %v125_v37 = vpop.xlane.xlu1 %124  ;;  %v128_v38 = vpop.xlane.xlu0 %127 }
 0x14a   :  { %3759 = vrsqrt.f32 %v136_v36  ;;  %v133_v39 = vmul.f32 0.03125, %v125_v37  ;;  %v134_v40 = vmul.f32 0.03125, %v128_v38 }
 0x14c   :  { %v137_v41 = vadd.f32 1e-05, %v133_v39  ;;  %v138_v42 = vadd.f32 1e-05, %v134_v40 }
 0x14d   :  { %v131_v43 = vpop.xlane.xlu1 %130 }
 0x14e   :  { %3761 = vrsqrt.f32 %v137_v41  ;;  %v135_v44 = vmul.f32 0.03125, %v131_v43 }
 0x14f   :  { %3763 = vrsqrt.f32 %v138_v42 }
 0x150   :  { %v139_v45 = vadd.f32 1e-05, %v135_v44 }
 0x152   :  { %3765 = vrsqrt.f32 %v139_v45 }
 0x154   :  { %v3760_v46 = vpop.eup %3759 }
 0x155   :  { %v144_v48 = vmul.f32 %v3760_v46, %v112_v12 }
 0x157   :  { %v154_v50 = vmul.f32 %v2982_v47, %v144_v48 }
 0x158   :  { %v3762_v51 = vpop.eup %3761 }
 0x159   :  { %v3764_v52 = vpop.eup %3763  ;;  %v164_v53 = vadd.f32 %v2983_v49, %v154_v50  ;;  %v145_v54 = vmul.f32 %v3762_v51, %v113_v20  ;;  %v4127_v20 = vshrl.u32 %v85_v19, 7 }
 0x15a   :  { %v146_v55 = vmul.f32 %v3764_v52, %v114_v13 }
 0x15b   :  { %3262 = vmatprep.mubr.msk.f32.mxu0 %vm94_vm0, %v164_v53  ;;  %v155_v56 = vmul.f32 %v2982_v47, %v145_v54  ;;  %vm90_vm4 = vcmp.le.s32.totalorder %v4132_v22, %v4127_v20 }
 0x15c   :  { %v3766_v57 = vpop.eup %3765  ;;  %v156_v58 = vmul.f32 %v2982_v47, %v146_v55 }
 0x15d   :  { %v165_v59 = vadd.f32 %v2983_v49, %v155_v56  ;;  %v147_v60 = vmul.f32 %v3766_v57, %v115_v21  ;;  %v4130_v21 = vadd.s32 8, %v4127_v20 }
 0x15e   :  { %v166_v61 = vadd.f32 %v2983_v49, %v156_v58 }
 0x15f   :  { %3263 = vmatmul.mubr.msk.f32.vlgmr.msra.gmra.mrb[0].mxu0 %vm94_vm0, %v165_v59  ;;  %v157_v62 = vmul.f32 %v2982_v47, %v147_v60  ;;  %vm91_vm2 = vcmp.le.s32.totalorder %v4132_v22, %v4130_v21  ;;  %v678_v59 = vld [vmem:[%s4676_s28] sm:$0xff]  ;;  %v679_v60 = vld [vmem:[%s4676_s28 + $0x8] sm:$0xff] }
 0x160   :  { %3265 = vmatprep.mubr.msk.f32.mxu0 %vm94_vm0, %v166_v61  ;;  %v680_v61 = vld [vmem:[%s4676_s28 + $0x10] sm:$0xff] }
 0x161   :  { %v167_v63 = vadd.f32 %v2983_v49, %v157_v62  ;;  %v3540_v62 = vpack.c.bf16 %v679_v60, %v678_v59 }
 0x163   :  { %3266 = vmatmul.mubr.msk.f32.gmra.mrb[2].mxu0 %vm94_vm0, %v167_v63  ;;  %v681_v63 = vld [vmem:[%s4676_s28 + $0x18] sm:$0xff] }
 0x232   :  { %v3264_v3 = vpop.f32.mrb[0].mxu0 }
 0x233   :  { %v250_v4 = vpop.f32.mrb[1].mxu0 }
 0x234   :  { %v4101_v6 = vpack.i.bf16 %v3264_v3, %v250_v4  ;;  %3272 = vmatprep.mubr.msk.f32.mxu1 %vm94_vm0, %v250_v4 }
 0x236   :  { %3720 = vrot.lane.b32.xlu0 %v4101_v6, %s3924_s2  ;;  %v3267_v7 = vpop.f32.mrb[2].mxu0 }
 0x237   :  { %v260_v8 = vpop.f32.mrb[3].mxu0 }
 0x238   :  { %v4106_v9 = vpack.i.bf16 %v3267_v7, %v260_v8  ;;  %3279 = vmatprep.mubr.msk.f32.mxu0 %vm94_vm0, %v260_v8 }
 0x23a   :  { %3725 = vrot.lane.b32.xlu1 %v4106_v9, %s3924_s2 }
 0x2a8   :  { %v3721_v10 = vpop.permute.xlu0 %3720 }
 0x2a9   :  { %v3723_v11 = vunpack.i.h.bf16 %v3721_v10  ;;  %v3722_v12 = vunpack.i.l.bf16 %v3721_v10 }
 0x2ab   :  { %v3520_v14 = vpack.c.bf16 %v3723_v11, %v3722_v12 }
 0x2ac   :  { %v3726_v15 = vpop.permute.xlu1 %3725 }
 0x2ad   :  { %v3728_v16 = vunpack.i.h.bf16 %v3726_v15  ;;  %v3727_v17 = vunpack.i.l.bf16 %v3726_v15  ;;  %3522 = vmatprep.subr.msk.bf16.mxu1 %vm4113_vm1, %v3520_v14 }
 0x2ae   :  { %3525 = vmatpush3.bf16.xpose.msk.msra.mxu1 %vm4113_vm1, %v3520_v14 }
 0x2af   :  { %v3526_v18 = vpack.c.bf16 %v3728_v16, %v3727_v17 }
 0x2b1   :  { %3528 = vmatprep.subr.msk.bf16.mxu0 %vm4113_vm1, %v3526_v18 }
 0x2b2   :  { %3531 = vmatpush3.bf16.xpose.msk.msra.mxu0 %vm4113_vm1, %v3526_v18 }
 0x2b3   :  { %3541 = vmatprep.subr.bf16.mxu0 %v3540_v62 }
 0x2b5   :  { %3273 = vmatmul.mubr.msk.f32.vlgmr.msra.gmra.mrb[0].mxu1 %vm94_vm0, %v3264_v3  ;;  %v3544_v3 = vpack.c.bf16 %v681_v63, %v680_v61  ;;  %v857_v61 = vld [vmem:[%s4644_s8] sm:$0xff] }
 0x2b9   :  { %3280 = vmatmul.mubr.msk.f32.vlgmr.msra.gmra.mrb[4].mxu0 %vm94_vm0, %v3267_v7 }
 0x2ba   :  { %3543 = vmatpush3.bf16.msra.mxu0 %v3540_v62  ;;  %v858_v62 = vld [vmem:[%s4644_s8 + $0x8] sm:$0xff] }
 0x2bb   :  { %3545 = vmatprep.subr.bf16.mxu0 %v3544_v3  ;;  %v3548_v63 = vpack.c.bf16 %v858_v62, %v857_v61  ;;  %v1011_v62 = vld [vmem:[%s4646_s10 + $0x70] sm:$0xff] }
 0x2be   :  { %3547 = vmatpush3.bf16.msra.mxu0 %v3544_v3  ;;  %v859_v3 = vld [vmem:[%s4644_s8 + $0x10] sm:$0xff] }
 0x388   :  { %v3274_v23 = vpop.f32.mrb[0].mxu1 }
 0x389   :  { %v448_v24 = vmul.f32 0.17677669, %v3274_v23  ;;  %v349_v25 = vpop.f32.mrb[1].mxu1 }
 0x38a   :  { %v447_v26 = vmul.f32 0.17677669, %v349_v25 }
 0x38b   :  { %v456_v27 = vsel %vm91_vm2, %v448_v24, -1e+09 }
 0x38c   :  { %v3281_v28 = vpop.f32.mrb[4].mxu0  ;;  %v463_v29 = vsel %vm459_vm3, %v456_v27, -inf  ;;  %v455_v30 = vsel %vm90_vm4, %v447_v26, -1e+09 }
 0x38d   :  { %v450_v31 = vmul.f32 0.17677669, %v3281_v28  ;;  %v438_v32 = vpop.f32.mrb[5].mxu0  ;;  %464 = vmax.xlane.f32.xlu0 %v463_v29  ;;  %v460_v33 = vsel %vm459_vm3, %v455_v30, -inf }
 0x38e   :  { %v449_v34 = vmul.f32 0.17677669, %v438_v32  ;;  %461 = vmax.xlane.f32.xlu1 %v460_v33 }
 0x38f   :  { %v458_v35 = vsel %vm91_vm2, %v450_v31, -1e+09 }
 0x390   :  { %v457_v36 = vsel %vm90_vm4, %v449_v34, -1e+09  ;;  %v469_v37 = vsel %vm459_vm3, %v458_v35, -inf }
 0x391   :  { %v466_v38 = vsel %vm459_vm3, %v457_v36, -inf }
 0x392   :  { %467 = vmax.xlane.f32.xlu0 %v466_v38  ;;  %470 = vmax.xlane.f32.xlu1 %v469_v37 }
 0x41a   :  { %v465_v39 = vpop.xlane.xlu0 %464 }
 0x41b   :  { %v473_v40 = vsub.f32 %v456_v27, %v465_v39  ;;  %v462_v41 = vpop.xlane.xlu1 %461 }
 0x41c   :  { %v472_v42 = vsub.f32 %v455_v30, %v462_v41 }
 0x41d   :  { %v478_v43 = vmul.f32 1.442695, %v473_v40 }
 0x41e   :  { %v476_v44 = vmul.f32 1.442695, %v472_v42 }
 0x41f   :  { %3767 = vpow2.f32 %v478_v43  ;;  %v468_v45 = vpop.xlane.xlu0 %467  ;;  %v471_v46 = vpop.xlane.xlu1 %470 }
 0x420   :  { %3769 = vpow2.f32 %v476_v44  ;;  %v474_v47 = vsub.f32 %v457_v36, %v468_v45  ;;  %v475_v48 = vsub.f32 %v458_v35, %v471_v46 }
 0x422   :  { %v480_v49 = vmul.f32 1.442695, %v474_v47  ;;  %v482_v50 = vmul.f32 1.442695, %v475_v48 }
 0x424   :  { %3771 = vpow2.f32 %v480_v49 }
 0x425   :  { %3773 = vpow2.f32 %v482_v50 }
 0x429   :  { %v3768_v51 = vpop.eup %3767 }
 0x42a   :  { %v3770_v52 = vpop.eup %3769  ;;  %v487_v53 = vsel %vm459_vm3, %v3768_v51, 0.0 }
 0x42b   :  { %488 = vadd.xlane.f32.xlu1 %v487_v53  ;;  %v484_v54 = vsel %vm459_vm3, %v3770_v52, 0.0 }
 0x42c   :  { %485 = vadd.xlane.f32.xlu0 %v484_v54 }
 0x42e   :  { %v3772_v55 = vpop.eup %3771 }
 0x42f   :  { %v3774_v56 = vpop.eup %3773  ;;  %v490_v57 = vsel %vm459_vm3, %v3772_v55, 0.0 }
 0x430   :  { %491 = vadd.xlane.f32.xlu0 %v490_v57  ;;  %v493_v58 = vsel %vm459_vm3, %v3774_v56, 0.0 }
 0x431   :  { %494 = vadd.xlane.f32.xlu1 %v493_v58 }
 0x442   :  { %3735 = vrot.lane.b32.xlu1 %v4106_v9, %s3925_s25 }
 0x446   :  { %3730 = vrot.lane.b32.xlu0 %v4101_v6, %s3925_s25 }
 0x4b8   :  { %v489_v4 = vpop.xlane.xlu1 %488 }
 0x4b9   :  { %v486_v6 = vpop.xlane.xlu0 %485 }
 0x4ba   :  { %3775 = vrcp.f32 %v486_v6 }
 0x4bb   :  { %3777 = vrcp.f32 %v489_v4  ;;  %v860_v4 = vld [vmem:[%s4644_s8 + $0x18] sm:$0xff] }
 0x4bc   :  { %v3552_v6 = vpack.c.bf16 %v860_v4, %v859_v3  ;;  %v3006_v4 = vld [vmem:[%s4645_s9] ss:$0 sm:$0xff] }
 0x4bd   :  { %v492_v7 = vpop.xlane.xlu0 %491 }
 0x4be   :  { %3779 = vrcp.f32 %v492_v7  ;;  %v495_v8 = vpop.xlane.xlu1 %494 }
 0x4bf   :  { %3781 = vrcp.f32 %v495_v8 }
 0x4c1   :  { %v3731_v9 = vpop.permute.xlu0 %3730 }
 0x4c2   :  { %v3733_v10 = vunpack.i.h.bf16 %v3731_v9  ;;  %v3732_v11 = vunpack.i.l.bf16 %v3731_v9  ;;  %v3736_v12 = vpop.permute.xlu1 %3735 }
 0x4c3   :  { %v3738_v14 = vunpack.i.h.bf16 %v3736_v12  ;;  %v3737_v15 = vunpack.i.l.bf16 %v3736_v12 }
 0x4c4   :  { %v3776_v16 = vpop.eup %3775  ;;  %v3532_v17 = vpack.c.bf16 %v3733_v10, %v3732_v11 }
 0x4c5   :  { %v3778_v18 = vpop.eup %3777  ;;  %v500_v19 = vmul.f32 %v3776_v16, %v3770_v52  ;;  %v3536_v23 = vpack.c.bf16 %v3738_v14, %v3737_v15 }
 0x4c6   :  { %3533 = vmatprep.subr.bf16.mxu1 %v3532_v17  ;;  %v501_v25 = vmul.f32 %v3778_v18, %v3768_v51 }
 0x4c7   :  { %3535 = vmatpush3.bf16.msra.mxu1 %v3532_v17  ;;  %3286 = vmatprep.mubr.msk.f32.mxu1 %vm459_vm3, %v500_v19 }
 0x4c8   :  { %v3780_v24 = vpop.eup %3779  ;;  %3537 = vmatprep.subr.bf16.mxu1 %v3536_v23 }
 0x4c9   :  { %v3782_v26 = vpop.eup %3781  ;;  %v502_v27 = vmul.f32 %v3780_v24, %v3772_v55  ;;  %v3004_v24 = vld [vmem:[%s4642_s6] ss:$0 sm:$0xff] }
 0x4ca   :  { %3287 = vmatmul.mubr.msk.f32.vlgmr.msra.gmra.mrb[2].mxu1 %vm459_vm3, %v501_v25  ;;  %v503_v28 = vmul.f32 %v3782_v26, %v3774_v56 }
 0x4cb   :  { %3539 = vmatpush3.bf16.msra.mxu1 %v3536_v23  ;;  %3293 = vmatprep.mubr.msk.f32.mxu1 %vm459_vm3, %v502_v27 }
 0x4cc   :  { %3549 = vmatprep.subr.bf16.mxu1 %v3548_v63 }
 0x4ce   :  { %3294 = vmatmul.mubr.msk.f32.vlgmr.msra.gmra.mrb[4].mxu1 %vm459_vm3, %v503_v28  ;;  %v3005_v28 = vld [vmem:[%s4643_s7] ss:$0 sm:$0xff] }
 0x4cf   :  { %3551 = vmatpush3.bf16.msra.mxu1 %v3548_v63  ;;  %v1012_v63 = vld [vmem:[%s4646_s10 + $0x78] sm:$0xff] }
 0x4d0   :  { %3553 = vmatprep.subr.bf16.mxu1 %v3552_v6  ;;  %v3584_v3 = vpack.c.bf16 %v1012_v63, %v1011_v62 }
 0x4d3   :  { %3555 = vmatpush3.bf16.msra.mxu1 %v3552_v6 }
 0x59d   :  { %v3288_v29 = vpop.f32.mrb[2].mxu1 }
 0x59e   :  { %v582_v30 = vpop.f32.mrb[3].mxu1 }
 0x59f   :  { %3304 = vmatprep.mubr.msk.f32.mxu0 %vm94_vm0, %v582_v30 }
 0x5a0   :  { %3305 = vmatmul.mubr.msk.f32.vlgmr.msra.gmra.mrb[6].mxu0 %vm94_vm0, %v3288_v29 }
 0x5a1   :  { %v3295_v31 = vpop.f32.mrb[4].mxu1 }
 0x5a2   :  { %v669_v32 = vpop.f32.mrb[5].mxu1 }
 0x5a3   :  { %3307 = vmatprep.mubr.msk.f32.mxu0 %vm94_vm0, %v669_v32 }
 0x5a4   :  { %3308 = vmatmul.mubr.msk.f32.gmra.mrb[8].mxu0 %vm94_vm0, %v3295_v31 }
 0x673   :  { %v3306_v33 = vpop.f32.mrb[6].mxu0 }
 0x674   :  { %v4183_v34 = vadd.f32 %v3306_v33, %v4056_v2  ;;  %v760_v35 = vpop.f32.mrb[7].mxu0 }
 0x675   :  { %v4186_v36 = vadd.f32 %v760_v35, %v4046_v0 }
 0x676   :  { %v788_v37 = vsel %vm94_vm0, %v4183_v34, 0.0 }
 0x677   :  { %789 = vadd.xlane.f32.xlu0 %v788_v37  ;;  %v3309_v38 = vpop.f32.mrb[8].mxu0  ;;  %v785_v39 = vsel %vm94_vm0, %v4186_v36, 0.0 }
 0x678   :  { %v4193_v40 = vadd.f32 %v3309_v38, %v4065_v5  ;;  %786 = vadd.xlane.f32.xlu1 %v785_v39  ;;  %v770_v41 = vpop.f32.mrb[9].mxu0 }
 0x679   :  { %v4196_v2 = vadd.f32 %v770_v41, %v4051_v1 }
 0x67a   :  { %v794_v0 = vsel %vm94_vm0, %v4193_v40, 0.0 }
 0x67b   :  { %v791_v42 = vsel %vm94_vm0, %v4196_v2, 0.0 }
 0x67c   :  { %795 = vadd.xlane.f32.xlu1 %v794_v0  ;;  %792 = vadd.xlane.f32.xlu0 %v791_v42 }
 0x704   :  { %v790_v43 = vpop.xlane.xlu0 %789 }
 0x705   :  { %v798_v44 = vmul.f32 0.03125, %v790_v43  ;;  %v787_v45 = vpop.xlane.xlu1 %786  ;;  %v997_v43 = vld [vmem:[%s4646_s10] sm:$0xff] }
 0x706   :  { %v797_v46 = vmul.f32 0.03125, %v787_v45 }
 0x707   :  { %v802_v5 = vsub.f32 %v4183_v34, %v798_v44  ;;  %v998_v44 = vld [vmem:[%s4646_s10 + $0x8] sm:$0xff] }
 0x708   :  { %v801_v47 = vsub.f32 %v4186_v36, %v797_v46  ;;  %v3556_v45 = vpack.c.bf16 %v998_v44, %v997_v43  ;;  %v999_v46 = vld [vmem:[%s4646_s10 + $0x10] sm:$0xff] }
 0x709   :  { %v796_v48 = vpop.xlane.xlu1 %795  ;;  %v793_v49 = vpop.xlane.xlu0 %792  ;;  %v806_v1 = vmul.f32 %v802_v5, %v802_v5 }
 0x70a   :  { %v800_v50 = vmul.f32 0.03125, %v796_v48  ;;  %v799_v51 = vmul.f32 0.03125, %v793_v49  ;;  %v805_v52 = vmul.f32 %v801_v47, %v801_v47  ;;  %3557 = vmatprep.subr.bf16.mxu0 %v3556_v45  ;;  %v1001_v48 = vld [vmem:[%s4646_s10 + $0x20] sm:$0xff]  ;;  %v1002_v49 = vld [vmem:[%s4646_s10 + $0x28] sm:$0xff] }
 0x70b   :  { %v812_v53 = vsel %vm94_vm0, %v806_v1, 0.0  ;;  %3559 = vmatpush3.bf16.msra.mxu0 %v3556_v45  ;;  %v3564_v1 = vpack.c.bf16 %v1002_v49, %v1001_v48  ;;  %v3015_v45 = vld [vmem:[%s4647_s11] ss:$0 sm:$0xff] }
 0x70c   :  { %v804_v54 = vsub.f32 %v4193_v40, %v800_v50  ;;  %v803_v55 = vsub.f32 %v4196_v2, %v799_v51  ;;  %813 = vadd.xlane.f32.xlu1 %v812_v53  ;;  %v809_v56 = vsel %vm94_vm0, %v805_v52, 0.0  ;;  %v1003_v50 = vld [vmem:[%s4646_s10 + $0x30] sm:$0xff]  ;;  %v1004_v51 = vld [vmem:[%s4646_s10 + $0x38] sm:$0xff]  ;;  %v1005_v53 = vld [vmem:[%s4646_s10 + $0x40] sm:$0xff] }
 0x70d   :  { %810 = vadd.xlane.f32.xlu0 %v809_v56  ;;  %v3568_v52 = vpack.c.bf16 %v1004_v51, %v1003_v50  ;;  %v1007_v56 = vld [vmem:[%s4646_s10 + $0x50] sm:$0xff] }
 0x70e   :  { %v808_v57 = vmul.f32 %v804_v54, %v804_v54  ;;  %v807_v58 = vmul.f32 %v803_v55, %v803_v55 }
 0x710   :  { %v818_v59 = vsel %vm94_vm0, %v808_v57, 0.0  ;;  %v815_v60 = vsel %vm94_vm0, %v807_v58, 0.0  ;;  %v1008_v57 = vld [vmem:[%s4646_s10 + $0x58] sm:$0xff] }
 0x711   :  { %819 = vadd.xlane.f32.xlu1 %v818_v59  ;;  %816 = vadd.xlane.f32.xlu0 %v815_v60  ;;  %v3576_v58 = vpack.c.bf16 %v1008_v57, %v1007_v56  ;;  %v1009_v59 = vld [vmem:[%s4646_s10 + $0x60] sm:$0xff]  ;;  %v1010_v60 = vld [vmem:[%s4646_s10 + $0x68] sm:$0xff] }
 0x712   :  { %v3580_v61 = vpack.c.bf16 %v1010_v60, %v1009_v59 }
 0x799   :  { %v814_v7 = vpop.xlane.xlu1 %813 }
 0x79a   :  { %v822_v8 = vmul.f32 0.03125, %v814_v7  ;;  %v811_v9 = vpop.xlane.xlu0 %810 }
 0x79b   :  { %v821_v10 = vmul.f32 0.03125, %v811_v9 }
 0x79c   :  { %v826_v11 = vadd.f32 1e-05, %v822_v8 }
 0x79d   :  { %v825_v12 = vadd.f32 1e-05, %v821_v10 }
 0x79e   :  { %3783 = vrsqrt.f32 %v826_v11  ;;  %v820_v14 = vpop.xlane.xlu1 %819  ;;  %v817_v15 = vpop.xlane.xlu0 %816 }
 0x79f   :  { %3785 = vrsqrt.f32 %v825_v12  ;;  %v824_v16 = vmul.f32 0.03125, %v820_v14  ;;  %v823_v17 = vmul.f32 0.03125, %v817_v15 }
 0x7a1   :  { %v828_v18 = vadd.f32 1e-05, %v824_v16  ;;  %v827_v19 = vadd.f32 1e-05, %v823_v17 }
 0x7a3   :  { %3787 = vrsqrt.f32 %v828_v18 }
 0x7a4   :  { %3789 = vrsqrt.f32 %v827_v19 }
 0x7a8   :  { %v3784_v23 = vpop.eup %3783 }
 0x7a9   :  { %v3786_v25 = vpop.eup %3785  ;;  %v834_v26 = vmul.f32 %v3784_v23, %v802_v5  ;;  %v1000_v5 = vld [vmem:[%s4646_s10 + $0x18] sm:$0xff] }
 0x7aa   :  { %v833_v27 = vmul.f32 %v3786_v25, %v801_v47  ;;  %v3560_v47 = vpack.c.bf16 %v1000_v5, %v999_v46 }
 0x7ab   :  { %v844_v29 = vmul.f32 %v3004_v24, %v834_v26 }
 0x7ac   :  { %v843_v30 = vmul.f32 %v3004_v24, %v833_v27  ;;  %3561 = vmatprep.subr.bf16.mxu0 %v3560_v47 }
 0x7ad   :  { %v3788_v31 = vpop.eup %3787  ;;  %v854_v37 = vadd.f32 %v3005_v28, %v844_v29  ;;  %3563 = vmatpush3.bf16.msra.mxu0 %v3560_v47 }
 0x7ae   :  { %v3790_v32 = vpop.eup %3789  ;;  %v853_v33 = vadd.f32 %v3005_v28, %v843_v30  ;;  %v836_v35 = vmul.f32 %v3788_v31, %v804_v54  ;;  %3565 = vmatprep.subr.bf16.mxu0 %v3564_v1  ;;  %v1006_v54 = vld [vmem:[%s4646_s10 + $0x48] sm:$0xff] }
 0x7af   :  { %v835_v38 = vmul.f32 %v3790_v32, %v803_v55  ;;  %v3572_v55 = vpack.c.bf16 %v1006_v54, %v1005_v53 }
 0x7b0   :  { %3318 = vmatprep.mubr.msk.f32.mxu1 %vm94_vm0, %v853_v33  ;;  %v846_v39 = vmul.f32 %v3004_v24, %v836_v35 }
 0x7b1   :  { %3319 = vmatmul.mubr.msk.f32.vlgmr.msra.gmra.mrb[6].mxu1 %vm94_vm0, %v854_v37  ;;  %v845_v41 = vmul.f32 %v3004_v24, %v835_v38  ;;  %3567 = vmatpush3.bf16.msra.mxu0 %v3564_v1 }
 0x7b2   :  { %v856_v0 = vadd.f32 %v3005_v28, %v846_v39  ;;  %3569 = vmatprep.subr.bf16.mxu0 %v3568_v52 }
 0x7b3   :  { %v855_v42 = vadd.f32 %v3005_v28, %v845_v41 }
 0x7b5   :  { %3321 = vmatprep.mubr.msk.f32.mxu1 %vm94_vm0, %v855_v42  ;;  %3571 = vmatpush3.bf16.msra.mxu0 %v3568_v52 }
 0x7b6   :  { %3322 = vmatmul.mubr.msk.f32.gmra.mrb[8].mxu1 %vm94_vm0, %v856_v0  ;;  %3573 = vmatprep.subr.bf16.mxu0 %v3572_v55 }
 0x7b9   :  { %3575 = vmatpush3.bf16.msra.mxu0 %v3572_v55 }
 0x7ba   :  { %3577 = vmatprep.subr.bf16.mxu0 %v3576_v58 }
 0x7bd   :  { %3579 = vmatpush3.bf16.msra.mxu0 %v3576_v58 }
 0x7be   :  { %3581 = vmatprep.subr.bf16.mxu0 %v3580_v61 }
 0x7c1   :  { %3583 = vmatpush3.bf16.msra.mxu0 %v3580_v61 }
 0x7c2   :  { %3585 = vmatprep.subr.bf16.mxu0 %v3584_v3 }
 0x7c5   :  { %3587 = vmatpush3.bf16.msra.mxu0 %v3584_v3 }
 0x884   :  { %v3320_v6 = vpop.f32.mrb[6].mxu1 }
 0x885   :  { %v952_v7 = vadd.f32 %v3320_v6, %v3006_v4  ;;  %v946_v8 = vpop.f32.mrb[7].mxu1 }
 0x886   :  { %v947_v9 = vadd.f32 %v3006_v4, %v946_v8 }
 0x887   :  { %v3012_v10 = vmul.f32 -1.702, %v952_v7 }
 0x888   :  { %v3011_v11 = vmul.f32 -1.702, %v947_v9 }
 0x889   :  { %v975_v12 = vmul.f32 1.442695, %v3012_v10  ;;  %v3323_v14 = vpop.f32.mrb[8].mxu1 }
 0x88a   :  { %v973_v15 = vmul.f32 1.442695, %v3011_v11  ;;  %v962_v16 = vadd.f32 %v3323_v14, %v3006_v4  ;;  %v956_v17 = vpop.f32.mrb[9].mxu1 }
 0x88b   :  { %3791 = vpow2.f32 %v975_v12  ;;  %v957_v18 = vadd.f32 %v3006_v4, %v956_v17  ;;  %v3021_v17 = vld [vmem:[%s4671_s26 + $0x28] sm:$0xff] }
 0x88c   :  { %3793 = vpow2.f32 %v973_v15  ;;  %v3014_v19 = vmul.f32 -1.702, %v962_v16 }
 0x88d   :  { %v3013_v23 = vmul.f32 -1.702, %v957_v18 }
 0x88e   :  { %v979_v24 = vmul.f32 1.442695, %v3014_v19  ;;  %v3022_v19 = vld [vmem:[%s4671_s26 + $0x30] sm:$0xff] }
 0x88f   :  { %v977_v25 = vmul.f32 1.442695, %v3013_v23  ;;  %v3023_v23 = vld [vmem:[%s4671_s26 + $0x38] sm:$0xff] }
 0x890   :  { %3795 = vpow2.f32 %v979_v24  ;;  %v3592_v24 = vpack.c.bf16 %v3023_v23, %v3022_v19 }
 0x891   :  { %3797 = vpow2.f32 %v977_v25 }
 0x895   :  { %v3792_v26 = vpop.eup %3791 }
 0x896   :  { %v3794_v27 = vpop.eup %3793  ;;  %v982_v28 = vadd.f32 1.0, %v3792_v26 }
 0x897   :  { %v981_v29 = vadd.f32 1.0, %v3794_v27 }
 0x898   :  { %3799 = vrcp.f32 %v982_v28 }
 0x899   :  { %3801 = vrcp.f32 %v981_v29 }
 0x89a   :  { %v3796_v30 = vpop.eup %3795 }
 0x89b   :  { %v3798_v31 = vpop.eup %3797  ;;  %v984_v32 = vadd.f32 1.0, %v3796_v30 }
 0x89c   :  { %v983_v33 = vadd.f32 1.0, %v3798_v31 }
 0x89d   :  { %3803 = vrcp.f32 %v984_v32 }
 0x89e   :  { %3805 = vrcp.f32 %v983_v33 }
 0x8a2   :  { %v3800_v35 = vpop.eup %3799 }
 0x8a3   :  { %v3802_v37 = vpop.eup %3801  ;;  %v994_v39 = vmul.f32 %v3800_v35, %v952_v7 }
 0x8a4   :  { %v993_v38 = vmul.f32 %v3802_v37, %v947_v9 }
 0x8a6   :  { %3356 = vmatprep.mubr.f32.mxu0 %v993_v38 }
 0x8a7   :  { %v3804_v41 = vpop.eup %3803  ;;  %3357 = vmatmul.mubr.f32.vlgmr.msra.gmra.mrb[10].mxu0 %v994_v39 }
 0x8a8   :  { %v3806_v0 = vpop.eup %3805  ;;  %v996_v43 = vmul.f32 %v3804_v41, %v962_v16  ;;  %v3020_v16 = vld [vmem:[%s4671_s26 + $0x20] sm:$0xff] }
 0x8a9   :  { %v995_v42 = vmul.f32 %v3806_v0, %v957_v18  ;;  %v3588_v18 = vpack.c.bf16 %v3021_v17, %v3020_v16  ;;  %v3018_v41 = vld [vmem:[%s4672_s22 + $0x1] ss:$0 sm:$0xff] }
 0x8ab   :  { %3359 = vmatprep.mubr.f32.mxu0 %v995_v42  ;;  %3589 = vmatprep.subr.bf16.mxu1 %v3588_v18 }
 0x8ac   :  { %3360 = vmatmul.mubr.f32.gmra.mrb[12].mxu0 %v996_v43  ;;  %3591 = vmatpush3.bf16.msra.mxu1 %v3588_v18 }
 0x8ad   :  { %3593 = vmatprep.subr.bf16.mxu1 %v3592_v24 }
 0x8b0   :  { %3595 = vmatpush3.bf16.msra.mxu1 %v3592_v24 }
 0x97a   :  { %v3358_v44 = vpop.f32.mrb[10].mxu0 }
 0x97b   :  { %v1099_v46 = vadd.f32 %v3358_v44, %v4183_v34  ;;  %v1079_v5 = vpop.f32.mrb[11].mxu0  ;;  %v3019_v44 = vld [vmem:[%s4673_s24 + $0x1] ss:$0 sm:$0xff] }
 0x97c   :  { %v1098_v47 = vadd.f32 %v1079_v5, %v4186_v36 }
 0x97d   :  { %v4288_v48 = vadd.f32 %v3015_v45, %v1099_v46 }
 0x97e   :  { %v4290_v49 = vadd.f32 %v3015_v45, %v1098_v47 }
 0x97f   :  { %v3361_v1 = vpop.f32.mrb[12].mxu0  ;;  %v1120_v50 = vsel %vm94_vm0, %v4288_v48, 0.0 }
 0x980   :  { %v1101_v51 = vadd.f32 %v3361_v1, %v4193_v40  ;;  %v1089_v52 = vpop.f32.mrb[13].mxu0  ;;  %1121 = vadd.xlane.f32.xlu1 %v1120_v50  ;;  %v1117_v53 = vsel %vm94_vm0, %v4290_v49, 0.0 }
 0x981   :  { %v1100_v34 = vadd.f32 %v1089_v52, %v4196_v2  ;;  %1118 = vadd.xlane.f32.xlu0 %v1117_v53 }
 0x982   :  { %v4298_v54 = vadd.f32 %v3015_v45, %v1101_v51 }
 0x983   :  { %v4300_v36 = vadd.f32 %v3015_v45, %v1100_v34 }
 0x984   :  { %v1126_v55 = vsel %vm94_vm0, %v4298_v54, 0.0 }
 0x985   :  { %1127 = vadd.xlane.f32.xlu1 %v1126_v55  ;;  %v1123_v56 = vsel %vm94_vm0, %v4300_v36, 0.0 }
 0x986   :  { %1124 = vadd.xlane.f32.xlu0 %v1123_v56 }
 0xa0d   :  { %v1122_v40 = vpop.xlane.xlu1 %1121 }
 0xa0e   :  { %v1130_v57 = vmul.f32 0.03125, %v1122_v40  ;;  %v1119_v58 = vpop.xlane.xlu0 %1118 }
 0xa0f   :  { %v1129_v59 = vmul.f32 0.03125, %v1119_v58 }
 0xa10   :  { %v1134_v60 = vsub.f32 %v4288_v48, %v1130_v57 }
 0xa11   :  { %v1133_v2 = vsub.f32 %v4290_v49, %v1129_v59 }
 0xa12   :  { %v1128_v61 = vpop.xlane.xlu1 %1127  ;;  %v1138_v62 = vmul.f32 %v1134_v60, %v1134_v60 }
 0xa13   :  { %v1132_v63 = vmul.f32 0.03125, %v1128_v61  ;;  %v1125_v3 = vpop.xlane.xlu0 %1124  ;;  %v1137_v4 = vmul.f32 %v1133_v2, %v1133_v2 }
 0xa14   :  { %v1131_v6 = vmul.f32 0.03125, %v1125_v3  ;;  %v1144_v7 = vsel %vm94_vm0, %v1138_v62, 0.0 }
 0xa15   :  { %v1136_v8 = vsub.f32 %v4298_v54, %v1132_v63  ;;  %1145 = vadd.xlane.f32.xlu1 %v1144_v7  ;;  %v1141_v9 = vsel %vm94_vm0, %v1137_v4, 0.0 }
 0xa16   :  { %v1135_v10 = vsub.f32 %v4300_v36, %v1131_v6  ;;  %1142 = vadd.xlane.f32.xlu0 %v1141_v9 }
 0xa17   :  { %v1140_v11 = vmul.f32 %v1136_v8, %v1136_v8 }
 0xa18   :  { %v1139_v12 = vmul.f32 %v1135_v10, %v1135_v10 }
 0xa19   :  { %v1150_v14 = vsel %vm94_vm0, %v1140_v11, 0.0 }
 0xa1a   :  { %1151 = vadd.xlane.f32.xlu1 %v1150_v14  ;;  %v1147_v15 = vsel %vm94_vm0, %v1139_v12, 0.0 }
 0xa1b   :  { %1148 = vadd.xlane.f32.xlu0 %v1147_v15 }
 0xaa2   :  { %v1146_v25 = vpop.xlane.xlu1 %1145 }
 0xaa3   :  { %v1154_v26 = vmul.f32 0.03125, %v1146_v25  ;;  %v1143_v27 = vpop.xlane.xlu0 %1142 }
 0xaa4   :  { %v1153_v28 = vmul.f32 0.03125, %v1143_v27 }
 0xaa5   :  { %v1158_v29 = vadd.f32 1e-05, %v1154_v26 }
 0xaa6   :  { %v1157_v30 = vadd.f32 1e-05, %v1153_v28 }
 0xaa7   :  { %3807 = vrsqrt.f32 %v1158_v29  ;;  %v1152_v31 = vpop.xlane.xlu1 %1151 }
 0xaa8   :  { %3809 = vrsqrt.f32 %v1157_v30  ;;  %v1156_v32 = vmul.f32 0.03125, %v1152_v31  ;;  %v1149_v33 = vpop.xlane.xlu0 %1148 }
 0xaa9   :  { %v1155_v35 = vmul.f32 0.03125, %v1149_v33 }
 0xaaa   :  { %v1160_v37 = vadd.f32 1e-05, %v1156_v32 }
 0xaab   :  { %v1159_v38 = vadd.f32 1e-05, %v1155_v35 }
 0xaac   :  { %3811 = vrsqrt.f32 %v1160_v37 }
 0xaad   :  { %3813 = vrsqrt.f32 %v1159_v38 }
 0xab1   :  { %v3808_v39 = vpop.eup %3807 }
 0xab2   :  { %v3810_v0 = vpop.eup %3809  ;;  %v1166_v42 = vmul.f32 %v3808_v39, %v1134_v60 }
 0xab3   :  { %v1165_v43 = vmul.f32 %v3810_v0, %v1133_v2 }
 0xab4   :  { %v1176_v45 = vmul.f32 %v3018_v41, %v1166_v42 }
 0xab5   :  { %v1175_v46 = vmul.f32 %v3018_v41, %v1165_v43 }
 0xab6   :  { %v3812_v5 = vpop.eup %3811  ;;  %v1186_v51 = vadd.f32 %v3019_v44, %v1176_v45 }
 0xab7   :  { %v3814_v47 = vpop.eup %3813  ;;  %v1185_v1 = vadd.f32 %v3019_v44, %v1175_v46  ;;  %v1168_v50 = vmul.f32 %v3812_v5, %v1136_v8 }
 0xab8   :  { %v1167_v52 = vmul.f32 %v3814_v47, %v1135_v10  ;;  %v3040_v47 = vld [vmem:[%s4676_s28 + $0x20] sm:$0xff] }
 0xab9   :  { %3370 = vmatprep.mubr.msk.f32.mxu1 %vm94_vm0, %v1185_v1  ;;  %v1178_v53 = vmul.f32 %v3018_v41, %v1168_v50  ;;  %v3041_v1 = vld [vmem:[%s4676_s28 + $0x28] sm:$0xff]  ;;  %v3042_v50 = vld [vmem:[%s4676_s28 + $0x30] sm:$0xff] }
 0xaba   :  { %3371 = vmatmul.mubr.msk.f32.vlgmr.msra.gmra.mrb[10].mxu1 %vm94_vm0, %v1186_v51  ;;  %v1177_v34 = vmul.f32 %v3018_v41, %v1167_v52  ;;  %v3616_v51 = vpack.c.bf16 %v3041_v1, %v3040_v47  ;;  %v3043_v52 = vld [vmem:[%s4676_s28 + $0x38] sm:$0xff]  ;;  %v3053_v47 = vld [vmem:[%s4644_s8 + $0x28] sm:$0xff] }
 0xabb   :  { %v1188_v56 = vadd.f32 %v3019_v44, %v1178_v53  ;;  %v3620_v53 = vpack.c.bf16 %v3043_v52, %v3042_v50  ;;  %v3054_v50 = vld [vmem:[%s4644_s8 + $0x30] sm:$0xff] }
 0xabc   :  { %v1187_v55 = vadd.f32 %v3019_v44, %v1177_v34  ;;  %3617 = vmatprep.subr.bf16.mxu0 %v3616_v51 }
 0xabd   :  { %3619 = vmatpush3.bf16.msra.mxu0 %v3616_v51  ;;  %v3055_v51 = vld [vmem:[%s4644_s8 + $0x38] sm:$0xff] }
 0xabe   :  { %3373 = vmatprep.mubr.msk.f32.mxu1 %vm94_vm0, %v1187_v55  ;;  %3621 = vmatprep.subr.bf16.mxu0 %v3620_v53  ;;  %v3628_v52 = vpack.c.bf16 %v3055_v51, %v3054_v50 }
 0xabf   :  { %3374 = vmatmul.mubr.msk.f32.gmra.mrb[12].mxu1 %vm94_vm0, %v1188_v56 }
 0xac1   :  { %3623 = vmatpush3.bf16.msra.mxu0 %v3620_v53 }
 0xb8d   :  { %v3372_v40 = vpop.f32.mrb[10].mxu1 }
 0xb8e   :  { %v1272_v57 = vpop.f32.mrb[11].mxu1 }
 0xb8f   :  { %v4336_v58 = vpack.i.bf16 %v3372_v40, %v1272_v57  ;;  %3380 = vmatprep.mubr.msk.f32.mxu1 %vm94_vm0, %v1272_v57 }
 0xb91   :  { %3740 = vrot.lane.b32.xlu0 %v4336_v58, %s3924_s2 }
 0xb92   :  { %v3375_v59 = vpop.f32.mrb[12].mxu1 }
 0xb93   :  { %v1282_v60 = vpop.f32.mrb[13].mxu1 }
 0xb94   :  { %v4341_v2 = vpack.i.bf16 %v3375_v59, %v1282_v60 }
 0xb96   :  { %3745 = vrot.lane.b32.xlu1 %v4341_v2, %s3924_s2 }
 0xc03   :  { %v3741_v61 = vpop.permute.xlu0 %3740 }
 0xc04   :  { %v3743_v62 = vunpack.i.h.bf16 %v3741_v61  ;;  %v3742_v63 = vunpack.i.l.bf16 %v3741_v61 }
 0xc06   :  { %v3596_v3 = vpack.c.bf16 %v3743_v62, %v3742_v63 }
 0xc08   :  { %v3746_v4 = vpop.permute.xlu1 %3745  ;;  %3598 = vmatprep.subr.msk.bf16.mxu1 %vm4113_vm1, %v3596_v3 }
 0xc09   :  { %v3748_v6 = vunpack.i.h.bf16 %v3746_v4  ;;  %v3747_v7 = vunpack.i.l.bf16 %v3746_v4  ;;  %3601 = vmatpush3.bf16.xpose.msk.msra.mxu1 %vm4113_vm1, %v3596_v3 }
 0xc0b   :  { %v3602_v8 = vpack.c.bf16 %v3748_v6, %v3747_v7 }
 0xc0d   :  { %3604 = vmatprep.subr.msk.bf16.mxu1 %vm4113_vm1, %v3602_v8 }
 0xc10   :  { %3381 = vmatmul.mubr.msk.f32.vlgmr.msra.gmra.mrb[14].mxu1 %vm94_vm0, %v3372_v40 }
 0xc11   :  { %3607 = vmatpush3.bf16.xpose.msk.msra.mxu1 %vm4113_vm1, %v3602_v8  ;;  %3387 = vmatprep.mubr.msk.f32.mxu1 %vm94_vm0, %v1282_v60 }
 0xc18   :  { %3388 = vmatmul.mubr.msk.f32.vlgmr.msra.gmra.mrb[16].mxu1 %vm94_vm0, %v3375_v59 }
 0xce3   :  { %v3382_v9 = vpop.f32.mrb[14].mxu1 }
 0xce4   :  { %v1470_v10 = vmul.f32 0.17677669, %v3382_v9  ;;  %v1371_v11 = vpop.f32.mrb[15].mxu1 }
 0xce5   :  { %v1469_v12 = vmul.f32 0.17677669, %v1371_v11 }
 0xce6   :  { %v1474_v14 = vsel %vm91_vm2, %v1470_v10, -1e+09 }
 0xce7   :  { %v1480_v15 = vsel %vm459_vm3, %v1474_v14, -inf  ;;  %v1473_v16 = vsel %vm90_vm4, %v1469_v12, -1e+09 }
 0xce8   :  { %1481 = vmax.xlane.f32.xlu0 %v1480_v15  ;;  %v1477_v13 = vsel %vm459_vm3, %v1473_v16, -inf }
 0xce9   :  { %1478 = vmax.xlane.f32.xlu1 %v1477_v13 }
 0xceb   :  { %v3389_v17 = vpop.f32.mrb[16].mxu1 }
 0xcec   :  { %v1472_v18 = vmul.f32 0.17677669, %v3389_v17  ;;  %v1460_v19 = vpop.f32.mrb[17].mxu1 }
 0xced   :  { %v1471_v23 = vmul.f32 0.17677669, %v1460_v19 }
 0xcee   :  { %v1476_v24 = vsel %vm91_vm2, %v1472_v18, -1e+09 }
 0xcef   :  { %v1486_v25 = vsel %vm459_vm3, %v1476_v24, -inf  ;;  %v1475_v26 = vsel %vm90_vm4, %v1471_v23, -1e+09 }
 0xcf0   :  { %1487 = vmax.xlane.f32.xlu1 %v1486_v25  ;;  %v1483_v27 = vsel %vm459_vm3, %v1475_v26, -inf }
 0xcf1   :  { %1484 = vmax.xlane.f32.xlu0 %v1483_v27 }
 0xd75   :  { %v1482_v28 = vpop.xlane.xlu0 %1481 }
 0xd76   :  { %v1490_v29 = vsub.f32 %v1474_v14, %v1482_v28  ;;  %v1479_v30 = vpop.xlane.xlu1 %1478 }
 0xd77   :  { %v1489_v31 = vsub.f32 %v1473_v16, %v1479_v30 }
 0xd78   :  { %v1495_v32 = vmul.f32 1.442695, %v1490_v29 }
 0xd79   :  { %v1493_v33 = vmul.f32 1.442695, %v1489_v31 }
 0xd7a   :  { %3815 = vpow2.f32 %v1495_v32 }
 0xd7b   :  { %3817 = vpow2.f32 %v1493_v33 }
 0xd7d   :  { %v1488_v21 = vpop.xlane.xlu1 %1487 }
 0xd7e   :  { %v1492_v35 = vsub.f32 %v1476_v24, %v1488_v21  ;;  %v1485_v37 = vpop.xlane.xlu0 %1484 }
 0xd7f   :  { %v1491_v38 = vsub.f32 %v1475_v26, %v1485_v37 }
 0xd80   :  { %v1499_v39 = vmul.f32 1.442695, %v1492_v35 }
 0xd81   :  { %v1497_v41 = vmul.f32 1.442695, %v1491_v38 }
 0xd82   :  { %3819 = vpow2.f32 %v1499_v39 }
 0xd83   :  { %3821 = vpow2.f32 %v1497_v41 }
 0xd84   :  { %v3816_v20 = vpop.eup %3815 }
 0xd85   :  { %v3818_v0 = vpop.eup %3817  ;;  %v1504_v42 = vsel %vm459_vm3, %v3816_v20, 0.0 }
 0xd86   :  { %1505 = vadd.xlane.f32.xlu1 %v1504_v42  ;;  %v1501_v43 = vsel %vm459_vm3, %v3818_v0, 0.0 }
 0xd87   :  { %1502 = vadd.xlane.f32.xlu0 %v1501_v43 }
 0xd8c   :  { %v3820_v44 = vpop.eup %3819 }
 0xd8d   :  { %v3822_v45 = vpop.eup %3821  ;;  %v1510_v46 = vsel %vm459_vm3, %v3820_v44, 0.0 }
 0xd8e   :  { %1511 = vadd.xlane.f32.xlu1 %v1510_v46  ;;  %v1507_v5 = vsel %vm459_vm3, %v3822_v45, 0.0 }
 0xd8f   :  { %1508 = vadd.xlane.f32.xlu0 %v1507_v5  ;;  %v3052_v5 = vld [vmem:[%s4644_s8 + $0x20] sm:$0xff] }
 0xd90   :  { %v3624_v1 = vpack.c.bf16 %v3053_v47, %v3052_v5  ;;  %v3057_v47 = vld [vmem:[%s4645_s9 + $0x1] ss:$0 sm:$0xff] }
 0xd9f   :  { %3755 = vrot.lane.b32.xlu1 %v4341_v2, %s3925_s25 }
 0xda5   :  { %3750 = vrot.lane.b32.xlu0 %v4336_v58, %s3925_s25  ;;  %s4590_s25 = smov 0  }
 0xe13   :  { %v1506_v55 = vpop.xlane.xlu1 %1505 }
 0xe14   :  { %v1503_v34 = vpop.xlane.xlu0 %1502 }
 0xe15   :  { %3823 = vrcp.f32 %v1503_v34 }
 0xe16   :  { %3825 = vrcp.f32 %v1506_v55 }
 0xe1b   :  { %v1512_v56 = vpop.xlane.xlu1 %1511 }
 0xe1c   :  { %v1509_v40 = vpop.xlane.xlu0 %1508 }
 0xe1d   :  { %3827 = vrcp.f32 %v1509_v40 }
 0xe1e   :  { %3829 = vrcp.f32 %v1512_v56 }
 0xe1f   :  { %v3824_v57 = vpop.eup %3823  ;;  %v3756_v58 = vpop.permute.xlu1 %3755 }
 0xe20   :  { %v3751_v59 = vpop.permute.xlu0 %3750  ;;  %v1517_v60 = vmul.f32 %v3824_v57, %v3818_v0  ;;  %v3758_v2 = vunpack.i.h.bf16 %v3756_v58  ;;  %v3757_v61 = vunpack.i.l.bf16 %v3756_v58  ;;  %v3826_v4 = vpop.eup %3825 }
 0xe21   :  { %v3753_v62 = vunpack.i.h.bf16 %v3751_v59  ;;  %v3752_v63 = vunpack.i.l.bf16 %v3751_v59  ;;  %v1518_v8 = vmul.f32 %v3826_v4, %v3816_v20 }
 0xe22   :  { %3394 = vmatprep.mubr.msk.f32.mxu1 %vm459_vm3, %v1517_v60  ;;  %v3612_v6 = vpack.c.bf16 %v3758_v2, %v3757_v61 }
 0xe23   :  { %v3608_v3 = vpack.c.bf16 %v3753_v62, %v3752_v63 }
 0xe25   :  { %3609 = vmatprep.subr.bf16.mxu1 %v3608_v3 }
 0xe26   :  { %3611 = vmatpush3.bf16.msra.mxu1 %v3608_v3  ;;  %v3050_v3 = vld [vmem:[%s4642_s6 + $0x1] ss:$0 sm:$0xff] }
 0xe27   :  { %v3828_v7 = vpop.eup %3827  ;;  %3613 = vmatprep.subr.bf16.mxu1 %v3612_v6 }
 0xe28   :  { %v3830_v9 = vpop.eup %3829  ;;  %v1519_v10 = vmul.f32 %v3828_v7, %v3822_v45 }
 0xe29   :  { %3395 = vmatmul.mubr.msk.f32.vlgmr.msra.gmra.mrb[18].mxu1 %vm459_vm3, %v1518_v8  ;;  %v1520_v11 = vmul.f32 %v3830_v9, %v3820_v44  ;;  %v3051_v8 = vld [vmem:[%s4643_s7 + $0x1] ss:$0 sm:$0xff] }
 0xe2a   :  { %3615 = vmatpush3.bf16.msra.mxu1 %v3612_v6  ;;  %3401 = vmatprep.mubr.msk.f32.mxu1 %vm459_vm3, %v1519_v10 }
 0xe2b   :  { %3625 = vmatprep.subr.bf16.mxu1 %v3624_v1 }
 0xe2d   :  { %3402 = vmatmul.mubr.msk.f32.vlgmr.msra.gmra.mrb[20].mxu1 %vm459_vm3, %v1520_v11 }
 0xe2e   :  { %3627 = vmatpush3.bf16.msra.mxu1 %v3624_v1 }
 0xe2f   :  { %3629 = vmatprep.subr.bf16.mxu1 %v3628_v52 }
 0xe32   :  { %3631 = vmatpush3.bf16.msra.mxu1 %v3628_v52 }
 0xefc   :  { %v3396_v12 = vpop.f32.mrb[18].mxu1 }
 0xefd   :  { %v1599_v14 = vpop.f32.mrb[19].mxu1 }
 0xefe   :  { %3412 = vmatprep.mubr.msk.f32.mxu0 %vm94_vm0, %v1599_v14 }
 0xeff   :  { %3413 = vmatmul.mubr.msk.f32.vlgmr.msra.gmra.mrb[14].mxu0 %vm94_vm0, %v3396_v12 }
 0xf00   :  { %v3403_v15 = vpop.f32.mrb[20].mxu1 }
 0xf01   :  { %v1686_v16 = vpop.f32.mrb[21].mxu1 }
 0xf02   :  { %3415 = vmatprep.mubr.msk.f32.mxu0 %vm94_vm0, %v1686_v16 }
 0xf03   :  { %3416 = vmatmul.mubr.msk.f32.gmra.mrb[16].mxu0 %vm94_vm0, %v3403_v15 }
 0xfd2   :  { %v3414_v13 = vpop.f32.mrb[14].mxu0 }
 0xfd3   :  { %v4401_v17 = vadd.f32 %v3414_v13, %v4288_v48  ;;  %v1778_v18 = vpop.f32.mrb[15].mxu0 }
 0xfd4   :  { %v4404_v19 = vadd.f32 %v1778_v18, %v4290_v49 }
 0xfd5   :  { %v1808_v23 = vsel %vm94_vm0, %v4401_v17, 0.0 }
 0xfd6   :  { %1809 = vadd.xlane.f32.xlu0 %v1808_v23  ;;  %v3417_v24 = vpop.f32.mrb[16].mxu0  ;;  %v1805_v25 = vsel %vm94_vm0, %v4404_v19, 0.0 }
 0xfd7   :  { %v4411_v26 = vadd.f32 %v3417_v24, %v4298_v54  ;;  %1806 = vadd.xlane.f32.xlu1 %v1805_v25  ;;  %v1788_v27 = vpop.f32.mrb[17].mxu0 }
 0xfd8   :  { %v4414_v48 = vadd.f32 %v1788_v27, %v4300_v36  ;;  %v3066_v27 = vld [vmem:[%s4646_s10 + $0x80] sm:$0xff] }
 0xfd9   :  { %v1814_v49 = vsel %vm94_vm0, %v4411_v26, 0.0 }
 0xfda   :  { %v1811_v28 = vsel %vm94_vm0, %v4414_v48, 0.0 }
 0xfdb   :  { %1815 = vadd.xlane.f32.xlu1 %v1814_v49  ;;  %1812 = vadd.xlane.f32.xlu0 %v1811_v28  ;;  %v3067_v49 = vld [vmem:[%s4646_s10 + $0x88] sm:$0xff] }
 0xfdc   :  { %v3632_v28 = vpack.c.bf16 %v3067_v49, %v3066_v27 }
 0xfde   :  { %3633 = vmatprep.subr.bf16.mxu0 %v3632_v28 }
 0xfdf   :  { %3635 = vmatpush3.bf16.msra.mxu0 %v3632_v28 }
0x1063   :  { %v1810_v29 = vpop.xlane.xlu0 %1809 }
0x1064   :  { %v1818_v30 = vmul.f32 0.03125, %v1810_v29  ;;  %v1807_v31 = vpop.xlane.xlu1 %1806  ;;  %v3068_v29 = vld [vmem:[%s4646_s10 + $0x90] sm:$0xff] }
0x1065   :  { %v1817_v32 = vmul.f32 0.03125, %v1807_v31 }
0x1066   :  { %v1822_v54 = vsub.f32 %v4401_v17, %v1818_v30  ;;  %v3069_v30 = vld [vmem:[%s4646_s10 + $0x98] sm:$0xff] }
0x1067   :  { %v1821_v33 = vsub.f32 %v4404_v19, %v1817_v32  ;;  %v3636_v31 = vpack.c.bf16 %v3069_v30, %v3068_v29  ;;  %v3070_v32 = vld [vmem:[%s4646_s10 + $0xa0] sm:$0xff] }
0x1068   :  { %v1816_v21 = vpop.xlane.xlu1 %1815  ;;  %v1813_v35 = vpop.xlane.xlu0 %1812  ;;  %v1826_v36 = vmul.f32 %v1822_v54, %v1822_v54 }
0x1069   :  { %v1820_v37 = vmul.f32 0.03125, %v1816_v21  ;;  %v1819_v38 = vmul.f32 0.03125, %v1813_v35  ;;  %v1825_v39 = vmul.f32 %v1821_v33, %v1821_v33  ;;  %3637 = vmatprep.subr.bf16.mxu0 %v3636_v31  ;;  %v3072_v21 = vld [vmem:[%s4646_s10 + $0xb0] sm:$0xff]  ;;  %v3073_v35 = vld [vmem:[%s4646_s10 + $0xb8] sm:$0xff] }
0x106a   :  { %v1832_v41 = vsel %vm94_vm0, %v1826_v36, 0.0  ;;  %3639 = vmatpush3.bf16.msra.mxu0 %v3636_v31  ;;  %v3644_v36 = vpack.c.bf16 %v3073_v35, %v3072_v21 }
0x106b   :  { %v1824_v20 = vsub.f32 %v4411_v26, %v1820_v37  ;;  %v1823_v0 = vsub.f32 %v4414_v48, %v1819_v38  ;;  %1833 = vadd.xlane.f32.xlu1 %v1832_v41  ;;  %v1829_v42 = vsel %vm94_vm0, %v1825_v39, 0.0  ;;  %v3074_v37 = vld [vmem:[%s4646_s10 + $0xc0] sm:$0xff]  ;;  %v3075_v38 = vld [vmem:[%s4646_s10 + $0xc8] sm:$0xff]  ;;  %v3076_v41 = vld [vmem:[%s4646_s10 + $0xd0] sm:$0xff] }
0x106c   :  { %1830 = vadd.xlane.f32.xlu0 %v1829_v42  ;;  %v3648_v39 = vpack.c.bf16 %v3075_v38, %v3074_v37  ;;  %v3078_v42 = vld [vmem:[%s4646_s10 + $0xe0] sm:$0xff] }
0x106d   :  { %v1828_v43 = vmul.f32 %v1824_v20, %v1824_v20  ;;  %v1827_v44 = vmul.f32 %v1823_v0, %v1823_v0 }
0x106f   :  { %v1838_v45 = vsel %vm94_vm0, %v1828_v43, 0.0  ;;  %v1835_v46 = vsel %vm94_vm0, %v1827_v44, 0.0  ;;  %v3079_v43 = vld [vmem:[%s4646_s10 + $0xe8] sm:$0xff] }
0x1070   :  { %1839 = vadd.xlane.f32.xlu1 %v1838_v45  ;;  %1836 = vadd.xlane.f32.xlu0 %v1835_v46  ;;  %v3656_v44 = vpack.c.bf16 %v3079_v43, %v3078_v42  ;;  %v3080_v45 = vld [vmem:[%s4646_s10 + $0xf0] sm:$0xff]  ;;  %v3081_v46 = vld [vmem:[%s4646_s10 + $0xf8] sm:$0xff] }
0x1071   :  { %v3660_v5 = vpack.c.bf16 %v3081_v46, %v3080_v45 }
0x10f8   :  { %v1834_v53 = vpop.xlane.xlu1 %1833 }
0x10f9   :  { %v1842_v34 = vmul.f32 0.03125, %v1834_v53  ;;  %v1831_v55 = vpop.xlane.xlu0 %1830 }
0x10fa   :  { %v1841_v56 = vmul.f32 0.03125, %v1831_v55 }
0x10fb   :  { %v1846_v40 = vadd.f32 1e-05, %v1842_v34 }
0x10fc   :  { %v1845_v57 = vadd.f32 1e-05, %v1841_v56 }
0x10fd   :  { %3831 = vrsqrt.f32 %v1846_v40  ;;  %v1840_v58 = vpop.xlane.xlu1 %1839  ;;  %v1837_v59 = vpop.xlane.xlu0 %1836 }
0x10fe   :  { %3833 = vrsqrt.f32 %v1845_v57  ;;  %v1844_v60 = vmul.f32 0.03125, %v1840_v58  ;;  %v1843_v2 = vmul.f32 0.03125, %v1837_v59 }
0x1100   :  { %v1848_v61 = vadd.f32 1e-05, %v1844_v60  ;;  %v1847_v62 = vadd.f32 1e-05, %v1843_v2 }
0x1102   :  { %3835 = vrsqrt.f32 %v1848_v61 }
0x1103   :  { %3837 = vrsqrt.f32 %v1847_v62 }
0x1107   :  { %v3832_v63 = vpop.eup %3831 }
0x1108   :  { %v3834_v4 = vpop.eup %3833  ;;  %v1854_v6 = vmul.f32 %v3832_v63, %v1822_v54  ;;  %v3071_v54 = vld [vmem:[%s4646_s10 + $0xa8] sm:$0xff] }
0x1109   :  { %v1853_v7 = vmul.f32 %v3834_v4, %v1821_v33  ;;  %v3640_v33 = vpack.c.bf16 %v3071_v54, %v3070_v32 }
0x110a   :  { %v1864_v9 = vmul.f32 %v3050_v3, %v1854_v6 }
0x110b   :  { %v1863_v10 = vmul.f32 %v3050_v3, %v1853_v7  ;;  %3641 = vmatprep.subr.bf16.mxu0 %v3640_v33 }
0x110c   :  { %v3836_v11 = vpop.eup %3835  ;;  %v1874_v16 = vadd.f32 %v3051_v8, %v1864_v9  ;;  %3643 = vmatpush3.bf16.msra.mxu0 %v3640_v33 }
0x110d   :  { %v3838_v12 = vpop.eup %3837  ;;  %v1873_v14 = vadd.f32 %v3051_v8, %v1863_v10  ;;  %v1856_v15 = vmul.f32 %v3836_v11, %v1824_v20  ;;  %3645 = vmatprep.subr.bf16.mxu0 %v3644_v36  ;;  %v3077_v20 = vld [vmem:[%s4646_s10 + $0xd8] sm:$0xff] }
0x110e   :  { %v1855_v13 = vmul.f32 %v3838_v12, %v1823_v0  ;;  %v3652_v0 = vpack.c.bf16 %v3077_v20, %v3076_v41 }
0x110f   :  { %3426 = vmatprep.mubr.msk.f32.mxu1 %vm94_vm0, %v1873_v14  ;;  %v1866_v18 = vmul.f32 %v3050_v3, %v1856_v15 }
0x1110   :  { %3427 = vmatmul.mubr.msk.f32.vlgmr.msra.gmra.mrb[22].mxu1 %vm94_vm0, %v1874_v16  ;;  %v1865_v23 = vmul.f32 %v3050_v3, %v1855_v13  ;;  %3647 = vmatpush3.bf16.msra.mxu0 %v3644_v36 }
0x1111   :  { %v1876_v24 = vadd.f32 %v3051_v8, %v1866_v18  ;;  %3649 = vmatprep.subr.bf16.mxu0 %v3648_v39 }
0x1112   :  { %v1875_v25 = vadd.f32 %v3051_v8, %v1865_v23 }
0x1114   :  { %3429 = vmatprep.mubr.msk.f32.mxu1 %vm94_vm0, %v1875_v25  ;;  %3651 = vmatpush3.bf16.msra.mxu0 %v3648_v39  ;;  %v3083_v25 = vld [vmem:[%s4647_s11 + $0x1] ss:$0 sm:$0xff] }
0x1115   :  { %3430 = vmatmul.mubr.msk.f32.gmra.mrb[24].mxu1 %vm94_vm0, %v1876_v24  ;;  %3653 = vmatprep.subr.bf16.mxu0 %v3652_v0 }
0x1118   :  { %3655 = vmatpush3.bf16.msra.mxu0 %v3652_v0 }
0x1119   :  { %3657 = vmatprep.subr.bf16.mxu0 %v3656_v44 }
0x111c   :  { %3659 = vmatpush3.bf16.msra.mxu0 %v3656_v44 }
0x111d   :  { %3661 = vmatprep.subr.bf16.mxu0 %v3660_v5 }
0x1120   :  { %3663 = vmatpush3.bf16.msra.mxu0 %v3660_v5 }
0x11e3   :  { %v3428_v1 = vpop.f32.mrb[22].mxu1 }
0x11e4   :  { %v1974_v50 = vadd.f32 %v3428_v1, %v3057_v47  ;;  %v1968_v51 = vpop.f32.mrb[23].mxu1 }
0x11e5   :  { %v1969_v52 = vadd.f32 %v3057_v47, %v1968_v51 }
0x11e6   :  { %v3063_v53 = vmul.f32 -1.702, %v1974_v50 }
0x11e7   :  { %v3062_v34 = vmul.f32 -1.702, %v1969_v52 }
0x11e8   :  { %v1997_v55 = vmul.f32 1.442695, %v3063_v53  ;;  %v3431_v56 = vpop.f32.mrb[24].mxu1 }
0x11e9   :  { %v1995_v40 = vmul.f32 1.442695, %v3062_v34  ;;  %v1984_v57 = vadd.f32 %v3431_v56, %v3057_v47  ;;  %v1978_v58 = vpop.f32.mrb[25].mxu1  ;;  %v2212_v56 = vld [vmem:[%s4653_s17 + $0x8] sm:$0xff] }
0x11ea   :  { %3839 = vpow2.f32 %v1997_v55  ;;  %v1979_v59 = vadd.f32 %v3057_v47, %v1978_v58  ;;  %v2211_v55 = vld [vmem:[%s4653_s17] sm:$0xff]  ;;  %v2214_v58 = vld [vmem:[%s4653_s17 + $0x18] sm:$0xff] }
0x11eb   :  { %3841 = vpow2.f32 %v1995_v40  ;;  %v3065_v60 = vmul.f32 -1.702, %v1984_v57  ;;  %v3664_v40 = vpack.c.bf16 %v2212_v56, %v2211_v55 }
0x11ec   :  { %v3064_v2 = vmul.f32 -1.702, %v1979_v59 }
0x11ed   :  { %v2001_v61 = vmul.f32 1.442695, %v3065_v60  ;;  %3665 = vmatprep.subr.bf16.mxu1 %v3664_v40  ;;  %v2312_v60 = vld [vmem:[%s4652_s16] sm:$0xff] }
0x11ee   :  { %v1999_v62 = vmul.f32 1.442695, %v3064_v2  ;;  %3667 = vmatpush3.bf16.msra.mxu1 %v3664_v40  ;;  %v2313_v2 = vld [vmem:[%s4652_s16 + $0x8] sm:$0xff] }
0x11ef   :  { %3843 = vpow2.f32 %v2001_v61  ;;  %v3672_v61 = vpack.c.bf16 %v2313_v2, %v2312_v60  ;;  %v2420_v60 = vstv %s2417_s1  ;;  %v2421_v2 = vstv %s2419_s27 }
0x11f0   :  { %3845 = vpow2.f32 %v1999_v62 }
0x11f4   :  { %v3840_v63 = vpop.eup %3839 }
0x11f5   :  { %v3842_v3 = vpop.eup %3841  ;;  %v2004_v4 = vadd.f32 1.0, %v3840_v63 }
0x11f6   :  { %v2003_v6 = vadd.f32 1.0, %v3842_v3 }
0x11f7   :  { %3847 = vrcp.f32 %v2004_v4 }
0x11f8   :  { %3849 = vrcp.f32 %v2003_v6 }
0x11f9   :  { %v3844_v7 = vpop.eup %3843 }
0x11fa   :  { %v3846_v8 = vpop.eup %3845  ;;  %v2006_v9 = vadd.f32 1.0, %v3844_v7 }
0x11fb   :  { %v2005_v10 = vadd.f32 1.0, %v3846_v8 }
0x11fc   :  { %3851 = vrcp.f32 %v2006_v9 }
0x11fd   :  { %3853 = vrcp.f32 %v2005_v10 }
0x1201   :  { %v3848_v11 = vpop.eup %3847 }
0x1202   :  { %v3850_v12 = vpop.eup %3849  ;;  %v2016_v15 = vmul.f32 %v3848_v11, %v1974_v50 }
0x1203   :  { %v2015_v14 = vmul.f32 %v3850_v12, %v1969_v52 }
0x1205   :  { %3464 = vmatprep.mubr.f32.mxu0 %v2015_v14 }
0x1206   :  { %v3852_v16 = vpop.eup %3851  ;;  %3465 = vmatmul.mubr.f32.vlgmr.msra.gmra.mrb[18].mxu0 %v2016_v15 }
0x1207   :  { %v3854_v13 = vpop.eup %3853  ;;  %v2018_v23 = vmul.f32 %v3852_v16, %v1984_v57  ;;  %v2213_v57 = vld [vmem:[%s4653_s17 + $0x10] sm:$0xff]  ;;  %v3084_v16 = vld [vmem:[%s4648_s12] ss:$0 sm:$0xff] }
0x1208   :  { %v2017_v18 = vmul.f32 %v3854_v13, %v1979_v59  ;;  %v3668_v59 = vpack.c.bf16 %v2214_v58, %v2213_v57  ;;  %v2561_v57 = vld [vmem:[%s4650_s14] sm:$0xff]  }
0x120a   :  { %3467 = vmatprep.mubr.f32.mxu0 %v2017_v18  ;;  %3669 = vmatprep.subr.bf16.mxu1 %v3668_v59 }
0x120b   :  { %3468 = vmatmul.mubr.f32.gmra.mrb[20].mxu0 %v2018_v23  ;;  %3671 = vmatpush3.bf16.msra.mxu1 %v3668_v59 }
0x120c   :  { %3673 = vmatprep.subr.bf16.mxu1 %v3672_v61 }
0x12d9   :  { %v3466_v24 = vpop.f32.mrb[18].mxu0 }
0x12da   :  { %v2122_v27 = vadd.f32 %v3466_v24, %v4401_v17  ;;  %v2102_v49 = vpop.f32.mrb[19].mxu0  ;;  %v3085_v24 = vld [vmem:[%s4649_s13] ss:$0 sm:$0xff] }
0x12db   :  { %v2121_v28 = vadd.f32 %v2102_v49, %v4404_v19  ;;  %v2314_v49 = vld [vmem:[%s4652_s16 + $0x10] sm:$0xff] }
0x12dc   :  { %v2134_v29 = vadd.f32 %v3083_v25, %v2122_v27 }
0x12dd   :  { %v2133_v30 = vadd.f32 %v3083_v25, %v2121_v28  ;;  %v2315_v28 = vld [vmem:[%s4652_s16 + $0x18] sm:$0xff] }
0x12de   :  { %v3469_v31 = vpop.f32.mrb[20].mxu0  ;;  %v2142_v32 = vsel %vm94_vm0, %v2134_v29, 0.0 }
0x12df   :  { %v2124_v54 = vadd.f32 %v3469_v31, %v4411_v26  ;;  %v2112_v33 = vpop.f32.mrb[21].mxu0  ;;  %2143 = vadd.xlane.f32.xlu1 %v2142_v32  ;;  %v2139_v21 = vsel %vm94_vm0, %v2133_v30, 0.0 }
0x12e0   :  { %v2123_v35 = vadd.f32 %v2112_v33, %v4414_v48  ;;  %2140 = vadd.xlane.f32.xlu0 %v2139_v21  ;;  %v3676_v21 = vpack.c.bf16 %v2315_v28, %v2314_v49 }
0x12e1   :  { %v2136_v36 = vadd.f32 %v3083_v25, %v2124_v54 }
0x12e2   :  { %v2135_v37 = vadd.f32 %v3083_v25, %v2123_v35 }
0x12e3   :  { %v2148_v17 = vsel %vm94_vm0, %v2136_v36, 0.0 }
0x12e4   :  { %2149 = vadd.xlane.f32.xlu1 %v2148_v17  ;;  %v2145_v19 = vsel %vm94_vm0, %v2135_v37, 0.0 }
0x12e5   :  { %2146 = vadd.xlane.f32.xlu0 %v2145_v19  ;;  %v2423_v19 = vld [vmem:[%s4654_s18] sm:$0xff] }
0x136c   :  { %v2144_v38 = vpop.xlane.xlu1 %2143 }
0x136d   :  { %v2152_v39 = vmul.f32 0.03125, %v2144_v38  ;;  %v2141_v41 = vpop.xlane.xlu0 %2140  ;;  %v2424_v38 = vld [vmem:[%s4654_s18 + $0x8] sm:$0xff] }
0x136e   :  { %v2151_v20 = vmul.f32 0.03125, %v2141_v41  ;;  %v2425_v41 = vld [vmem:[%s4654_s18 + $0x10] sm:$0xff] }
0x136f   :  { %v2156_v26 = vsub.f32 %v2134_v29, %v2152_v39  ;;  %v3680_v39 = vpack.c.bf16 %v2424_v38, %v2423_v19 }
0x1370   :  { %v2155_v0 = vsub.f32 %v2133_v30, %v2151_v20  ;;  %v2426_v20 = vld [vmem:[%s4654_s18 + $0x18] sm:$0xff] }
0x1371   :  { %v2150_v42 = vpop.xlane.xlu1 %2149  ;;  %v2160_v43 = vmul.f32 %v2156_v26, %v2156_v26 }
0x1372   :  { %v2154_v44 = vmul.f32 0.03125, %v2150_v42  ;;  %v2147_v45 = vpop.xlane.xlu0 %2146  ;;  %v2159_v48 = vmul.f32 %v2155_v0, %v2155_v0  ;;  %v3684_v42 = vpack.c.bf16 %v2426_v20, %v2425_v41 }
0x1373   :  { %v2153_v46 = vmul.f32 0.03125, %v2147_v45  ;;  %v2166_v5 = vsel %vm94_vm0, %v2160_v43, 0.0 }
0x1374   :  { %v2158_v47 = vsub.f32 %v2136_v36, %v2154_v44  ;;  %2167 = vadd.xlane.f32.xlu1 %v2166_v5  ;;  %v2163_v1 = vsel %vm94_vm0, %v2159_v48, 0.0 }
0x1375   :  { %v2157_v50 = vsub.f32 %v2135_v37, %v2153_v46  ;;  %2164 = vadd.xlane.f32.xlu0 %v2163_v1 }
0x1376   :  { %v2162_v51 = vmul.f32 %v2158_v47, %v2158_v47 }
0x1377   :  { %v2161_v52 = vmul.f32 %v2157_v50, %v2157_v50 }
0x1378   :  { %v2172_v53 = vsel %vm94_vm0, %v2162_v51, 0.0 }
0x1379   :  { %2173 = vadd.xlane.f32.xlu1 %v2172_v53  ;;  %v2169_v34 = vsel %vm94_vm0, %v2161_v52, 0.0 }
0x137a   :  { %2170 = vadd.xlane.f32.xlu0 %v2169_v34 }
0x1401   :  { %v2168_v62 = vpop.xlane.xlu1 %2167 }
0x1402   :  { %v2176_v63 = vmul.f32 0.03125, %v2168_v62  ;;  %v2165_v3 = vpop.xlane.xlu0 %2164 }
0x1403   :  { %v2175_v4 = vmul.f32 0.03125, %v2165_v3 }
0x1404   :  { %v2180_v6 = vadd.f32 1e-05, %v2176_v63 }
0x1405   :  { %v2179_v7 = vadd.f32 1e-05, %v2175_v4 }
0x1406   :  { %3855 = vrsqrt.f32 %v2180_v6  ;;  %v2174_v8 = vpop.xlane.xlu1 %2173 }
0x1407   :  { %3857 = vrsqrt.f32 %v2179_v7  ;;  %v2178_v9 = vmul.f32 0.03125, %v2174_v8  ;;  %v2171_v10 = vpop.xlane.xlu0 %2170 }
0x1408   :  { %v2177_v11 = vmul.f32 0.03125, %v2171_v10 }
0x1409   :  { %v2182_v12 = vadd.f32 1e-05, %v2178_v9 }
0x140a   :  { %v2181_v14 = vadd.f32 1e-05, %v2177_v11 }
0x140b   :  { %3859 = vrsqrt.f32 %v2182_v12 }
0x140c   :  { %3861 = vrsqrt.f32 %v2181_v14 }
0x1410   :  { %v3856_v15 = vpop.eup %3855 }
0x1411   :  { %v3858_v13 = vpop.eup %3857  ;;  %v2188_v18 = vmul.f32 %v3856_v15, %v2156_v26 }
0x1412   :  { %v2187_v23 = vmul.f32 %v3858_v13, %v2155_v0 }
0x1413   :  { %v2198_v25 = vmul.f32 %v3084_v16, %v2188_v18 }
0x1414   :  { %v2197_v27 = vmul.f32 %v3084_v16, %v2187_v23 }
0x1415   :  { %v3860_v29 = vpop.eup %3859  ;;  %v2208_v54 = vadd.f32 %v3085_v24, %v2198_v25 }
0x1416   :  { %v3862_v30 = vpop.eup %3861  ;;  %v2207_v31 = vadd.f32 %v3085_v24, %v2197_v27  ;;  %v2190_v32 = vmul.f32 %v3860_v29, %v2158_v47 }
0x1417   :  { %v2189_v33 = vmul.f32 %v3862_v30, %v2157_v50 }
0x1418   :  { %3478 = vmatprep.mubr.msk.f32.mxu1 %vm94_vm0, %v2207_v31  ;;  %v2200_v35 = vmul.f32 %v3084_v16, %v2190_v32 }
0x1419   :  { %3479 = vmatmul.mubr.msk.f32.vlgmr.msra.gmra.mrb[26].mxu1 %vm94_vm0, %v2208_v54  ;;  %v2199_v36 = vmul.f32 %v3084_v16, %v2189_v33 }
0x141a   :  { %3675 = vmatpush3.bf16.msra.mxu1 %v3672_v61  ;;  %v2210_v17 = vadd.f32 %v3085_v24, %v2200_v35  ;;  %v2422_v61 = vsel %vm2418_vm5, %v2420_v60, %v2421_v2 }
0x141b   :  { %v2209_v37 = vadd.f32 %v3085_v24, %v2199_v36  ;;  %3677 = vmatprep.subr.bf16.mxu1 %v3676_v21 }
0x141d   :  { %3481 = vmatprep.mubr.msk.f32.mxu1 %vm94_vm0, %v2209_v37 }
0x141e   :  { %3482 = vmatmul.mubr.msk.f32.gmra.mrb[28].mxu1 %vm94_vm0, %v2210_v17 }
0x141f   :  { %3679 = vmatpush3.bf16.msra.mxu1 %v3676_v21 }
0x1420   :  { %3681 = vmatprep.subr.bf16.mxu1 %v3680_v39 }
0x14ec   :  { %v3480_v26 = vpop.f32.mrb[26].mxu1 }
0x14ed   :  { %2429 = vrot.lane.b32.xlu1 %v3480_v26, %s3924_s2  ;;  %v2293_v0 = vpop.f32.mrb[27].mxu1 }
0x14ee   :  { %2427 = vrot.lane.b32.xlu0 %v2293_v0, %s3924_s2  ;;  %3492 = vmatprep.mubr.msk.f32.mxu1 %vm94_vm0, %v2293_v0 }
0x14ef   :  { %3493 = vmatmul.mubr.msk.f32.vlgmr.msra.gmra.mrb[30].mxu1 %vm94_vm0, %v3480_v26 }
0x14f0   :  { %3683 = vmatpush3.bf16.msra.mxu1 %v3680_v39 }
0x14f1   :  { %v3483_v43 = vpop.f32.mrb[28].mxu1  ;;  %3685 = vmatprep.subr.bf16.mxu1 %v3684_v42 }
0x14f2   :  { %v2303_v44 = vpop.f32.mrb[29].mxu1 }
0x14f3   :  { %2431 = vrot.lane.b32.xlu1 %v2303_v44, %s3924_s2  ;;  %3495 = vmatprep.mubr.msk.f32.mxu1 %vm94_vm0, %v2303_v44 }
0x14f4   :  { %3496 = vmatmul.mubr.msk.f32.gmra.mrb[32].mxu1 %vm94_vm0, %v3483_v43 }
0x14f5   :  { %3687 = vmatpush3.bf16.msra.mxu1 %v3684_v42 }
0x14f7   :  { %2433 = vrot.lane.b32.xlu1 %v3483_v43, %s3924_s2 }
0x155f   :  { %v2430_v45 = vpop.permute.xlu1 %2429 }
0x1560   :  { %v2428_v48 = vpop.permute.xlu0 %2427 }
0x1561   :  { %3506 = vmatprep.mubr.msk.f32.mxu1 %vm94_vm0, %v2428_v48 }
0x1562   :  { %3507 = vmatmul.mubr.msk.f32.vlgmr.msra.gmra.mrb[34].mxu1 %vm94_vm0, %v2430_v45 }
0x1565   :  { %v2432_v46 = vpop.permute.xlu1 %2431 }
0x1566   :  { %3509 = vmatprep.mubr.msk.f32.mxu1 %vm94_vm0, %v2432_v46 }
0x1569   :  { %v2434_v5 = vpop.permute.xlu1 %2433 }
0x156a   :  { %3510 = vmatmul.mubr.msk.f32.gmra.mrb[36].mxu1 %vm94_vm0, %v2434_v5 }
0x15c2   :  { %v3494_v47 = vpop.f32.mrb[30].mxu1 }
0x15c3   :  { %v4574_v1 = vmul.f32 0.17677669, %v3494_v47  ;;  %v2394_v50 = vpop.f32.mrb[31].mxu1 }
0x15c4   :  { %v4576_v51 = vmul.f32 0.17677669, %v2394_v50 }
0x15c7   :  { %v3497_v52 = vpop.f32.mrb[32].mxu1 }
0x15c8   :  { %v4578_v53 = vmul.f32 0.17677669, %v3497_v52  ;;  %v2404_v34 = vpop.f32.mrb[33].mxu1 }
0x15c9   :  { %v4580_v55 = vmul.f32 0.17677669, %v2404_v34 }
0x1635   :  { %v3508_v56 = vpop.f32.mrb[34].mxu1 }
0x1636   :  { %v2509_v40 = vpop.f32.mrb[35].mxu1 }
0x1637   :  { %2528 = vxpose.xlu0.b32.start [1/4] (short) (narrow) %v2509_v40, 8 }
0x163b   :  { %2529 = vxpose.xlu0.b32.cont [2/4] (short) (narrow) %v3508_v56, 8 }
0x163d   :  { %v3511_v58 = vpop.f32.mrb[36].mxu1 }
0x163e   :  { %v2519_v59 = vpop.f32.mrb[37].mxu1 }
0x163f   :  { %2530 = vxpose.xlu0.b32.cont [3/4] (short) (narrow) %v2519_v59, 8 }
0x1643   :  { %2531 = vxpose.xlu0.b32.end [4/4] (short) (narrow) %v3511_v58, 8 }
0x16b7   :  { %v2544_v62 = vpop.trf.xlu0 }
0x16b8   :  { %v4586_v63 = vmul.f32 %v2544_v62, %v2422_v61 }
0x16b9 LB: > { %vm2592_vm6 = vcmask 1043456   ;;  %v3926_v22 = vmov 0.0   ;;  %v2578_v3 = vcombine.high %v3917_v57, %v3917_v57  ;;  %vm2579_vm7 = vcmask 31744   ;;  %s3099_s14 = sshll.u32 %s3921_s25, 2  ;;  %s3098_s29 = sshll.u32 %s3921_s25, 7  ;;  %s3921_s25 = sphi %s4590_s25, %s2567_s25   ;;  %v3917_v57 = vphi %v2561_v57, %v4677_v57  }
0x16ba   : > { %2661 = vmatprep.mubr.f32.mxu0 %v3926_v22  ;;  %2850 = vmatprep.mubr.f32.mxu1 %v3926_v22  ;;  %v3927_v4 = vmov 0   ;;  %s2575_s3 = scalar_lea.vmem %s4651_s15, %s3099_s14  ;;  %s2572_s0 = sadd.s32 2, %s3098_s29 }
0x16bb   : > { %3100 = vmatprep.subr.msk.mxu0 %vm2592_vm6, %v2578_v3  ;;  %3863 = vset.pattern.permute.xlu0 %v3927_v4  ;;  %v2576_v6 = vld [vmem:[%s2575_s3] sm:$0xf]  ;;  %s2570_s17 = sadd.s32 1, %s3098_s29  ;;  %s2573_s22 = sld [smem:[#allocation2 + %s2572_s0]] }
0x16bc   : > { %3101 = vmatpush1.msk.msra.mxu0 %vm2592_vm6, %v3917_v57  ;;  %2780 = vperm.xlu0 %3863, %v2576_v6   ;;  %s2571_s24 = sld [smem:[#allocation2 + %s2570_s17]]  ;;  %s2567_s25 = sadd.s32 1, %s3921_s25  }
0x16bd   : > { %3102 = vmatmul.mubr.msk.f32.vlgmr.msra.gmra.mrb[0].mxu0 %vm2579_vm7, %v4576_v51  ;;  %p2564_p5 = scmp.ge.s32.totalorder %s2567_s25, 4  }
0x16be   : > { %2667 = vmatprep.mubr.f32.mxu0 %v3926_v22 }
0x16c1   : > { %3103 = vmatmul.mubr.msk.f32.gmra.mrb[2].mxu0 %vm2579_vm7, %v4574_v1 }
0x16c2   : > { %2673 = vmatprep.mubr.f32.mxu0 %v3926_v22 }
0x16c5   : > { %3104 = vmatmul.mubr.msk.f32.gmra.mrb[4].mxu0 %vm2579_vm7, %v4580_v55 }
0x16c6   : > { %2679 = vmatprep.mubr.f32.mxu0 %v3926_v22 }
0x16c9   : > { %3105 = vmatmul.mubr.msk.f32.gmra.mrb[6].mxu0 %vm2579_vm7, %v4578_v53 }
0x1790   : > { %v2663_v7 = vpop.f32.mrb[0].mxu0 }
0x1791   : > { %v2665_v8 = vpop.f32.mrb[1].mxu0 }
0x1794   : > { %v2669_v9 = vpop.f32.mrb[2].mxu0 }
0x1795   : > { %v2686_v10 = vmax.f32 %v2663_v7, %v2669_v9  ;;  %v2671_v11 = vpop.f32.mrb[3].mxu0 }
0x1796   : > { %v2693_v12 = vmax.f32 %v2665_v8, %v2671_v11 }
0x1797   : > { %v2687_v14 = vrot.slane %v2686_v10, 4 }
0x1798   : > { %v2694_v15 = vrot.slane %v2693_v12, 4  ;;  %v2675_v16 = vpop.f32.mrb[4].mxu0 }
0x1799   : > { %v2688_v13 = vmax.f32 %v2686_v10, %v2687_v14  ;;  %v2677_v18 = vpop.f32.mrb[5].mxu0 }
0x179a   : > { %v2695_v23 = vmax.f32 %v2693_v12, %v2694_v15 }
0x179b   : > { %v2689_v24 = vrot.slane %v2688_v13, 2 }
0x179c   : > { %v2696_v25 = vrot.slane %v2695_v23, 2  ;;  %v2681_v27 = vpop.f32.mrb[6].mxu0 }
0x179d   : > { %v2690_v49 = vmax.f32 %v2688_v13, %v2689_v24  ;;  %v2732_v28 = vmax.f32 %v2675_v16, %v2681_v27  ;;  %v2683_v29 = vpop.f32.mrb[7].mxu0 }
0x179e   : > { %v2697_v30 = vmax.f32 %v2695_v23, %v2696_v25  ;;  %v2739_v31 = vmax.f32 %v2677_v18, %v2683_v29 }
0x179f   : > { %v2691_v32 = vrot.slane %v2690_v49, 1  ;;  %v2733_v54 = vrot.slane %v2732_v28, 4 }
0x17a0   : > { %v2698_v33 = vrot.slane %v2697_v30, 1  ;;  %v2740_v21 = vrot.slane %v2739_v31, 4 }
0x17a1   : > { %v2692_v35 = vmax.f32 %v2690_v49, %v2691_v32  ;;  %v2734_v36 = vmax.f32 %v2732_v28, %v2733_v54 }
0x17a2   : > { %v2699_v37 = vmax.f32 %v2697_v30, %v2698_v33  ;;  %v2741_v17 = vmax.f32 %v2739_v31, %v2740_v21 }
0x17a3   : > { %v2700_v19 = vsub.f32 %v2663_v7, %v2692_v35  ;;  %v2702_v38 = vsub.f32 %v2669_v9, %v2692_v35  ;;  %v2735_v39 = vrot.slane %v2734_v36, 2 }
0x17a4   : > { %v2701_v41 = vsub.f32 %v2665_v8, %v2699_v37  ;;  %v2703_v20 = vsub.f32 %v2671_v11, %v2699_v37  ;;  %v2742_v26 = vrot.slane %v2741_v17, 2 }
0x17a5   : > { %v2704_v0 = vmul.f32 1.442695, %v2700_v19  ;;  %v2708_v42 = vmul.f32 1.442695, %v2702_v38  ;;  %v2736_v43 = vmax.f32 %v2734_v36, %v2735_v39 }
0x17a6   : > { %v2706_v44 = vmul.f32 1.442695, %v2701_v41  ;;  %v2710_v45 = vmul.f32 1.442695, %v2703_v20  ;;  %v2743_v48 = vmax.f32 %v2741_v17, %v2742_v26 }
0x17a7   : > { %3864 = vpow2.f32 %v2704_v0  ;;  %v2737_v46 = vrot.slane %v2736_v43, 1 }
0x17a8   : > { %3866 = vpow2.f32 %v2708_v42  ;;  %v2744_v5 = vrot.slane %v2743_v48, 1 }
0x17a9   : > { %3868 = vpow2.f32 %v2706_v44  ;;  %v2738_v47 = vmax.f32 %v2736_v43, %v2737_v46 }
0x17aa   : > { %3870 = vpow2.f32 %v2710_v45  ;;  %v2745_v50 = vmax.f32 %v2743_v48, %v2744_v5 }
0x17ab   : > { %v2746_v52 = vsub.f32 %v2675_v16, %v2738_v47  ;;  %v2748_v34 = vsub.f32 %v2681_v27, %v2738_v47 }
0x17ac   : > { %v2747_v56 = vsub.f32 %v2677_v18, %v2745_v50  ;;  %v2749_v40 = vsub.f32 %v2683_v29, %v2745_v50 }
0x17ad   : > { %v2750_v58 = vmul.f32 1.442695, %v2746_v52  ;;  %v2754_v59 = vmul.f32 1.442695, %v2748_v34 }
0x17ae   : > { %v2752_v60 = vmul.f32 1.442695, %v2747_v56  ;;  %v2756_v2 = vmul.f32 1.442695, %v2749_v40  ;;  %v2781_v56 = vpop.permute.xlu0 %2780 }
0x17af   : > { %3872 = vpow2.f32 %v2750_v58  ;;  %v2859_v58 = vstv %s2573_s22 }
0x17b0   : > { %3874 = vpow2.f32 %v2754_v59  ;;  %v2857_v59 = vstv %s2571_s24 }
0x17b1   : > { %v3865_v61 = vpop.eup %3864  ;;  %3876 = vpow2.f32 %v2752_v60 }
0x17b2   : > { %v3867_v62 = vpop.eup %3866  ;;  %3878 = vpow2.f32 %v2756_v2 }
0x17b3   : > { %v3869_v22 = vpop.eup %3868  ;;  %v2712_v3 = vadd.f32 %v3867_v62, %v3865_v61 }
0x17b4   : > { %v3871_v4 = vpop.eup %3870 }
0x17b5   : > { %v2713_v6 = vrot.slane %v2712_v3, 4  ;;  %v2719_v7 = vadd.f32 %v3871_v4, %v3869_v22 }
0x17b7   : > { %v2714_v8 = vadd.f32 %v2713_v6, %v2712_v3  ;;  %v2720_v9 = vrot.slane %v2719_v7, 4 }
0x17b9   : > { %v3873_v10 = vpop.eup %3872  ;;  %v2715_v11 = vrot.slane %v2714_v8, 2  ;;  %v2721_v12 = vadd.f32 %v2720_v9, %v2719_v7  ;;  %v2868_v9 = vld [vmem:[%s4656_s20] sm:$0x7] (%p2564_p5) }
0x17ba   : > { %v3875_v14 = vpop.eup %3874 }
0x17bb   : > { %v3877_v15 = vpop.eup %3876  ;;  %v2758_v16 = vadd.f32 %v3875_v14, %v3873_v10  ;;  %v2722_v13 = vrot.slane %v2721_v12, 2  ;;  %v2716_v18 = vadd.f32 %v2715_v11, %v2714_v8  ;;  %v3928_v8 = vmov (%p2564_p5), 0.0  }
0x17bc   : > { %v3879_v23 = vpop.eup %3878  ;;  %2949 = vmatprep.mubr.f32.mxu0 (%p2564_p5), %v3928_v8 }
0x17bd   : > { %v2759_v24 = vrot.slane %v2758_v16, 4  ;;  %v2765_v25 = vadd.f32 %v3879_v23, %v3877_v15  ;;  %v2723_v27 = vadd.f32 %v2722_v13, %v2721_v12  ;;  %v2717_v49 = vrot.slane %v2716_v18, 1 }
0x17bf   : > { %v2760_v28 = vadd.f32 %v2759_v24, %v2758_v16  ;;  %v2766_v29 = vrot.slane %v2765_v25, 4  ;;  %v2724_v30 = vrot.slane %v2723_v27, 1  ;;  %v2718_v31 = vadd.f32 %v2717_v49, %v2716_v18 }
0x17c1   : > { %v2761_v32 = vrot.slane %v2760_v28, 2  ;;  %v2767_v54 = vadd.f32 %v2766_v29, %v2765_v25  ;;  %v2725_v33 = vadd.f32 %v2724_v30, %v2723_v27  ;;  %3880 = vrcp.f32 %v2718_v31 }
0x17c3   : > { %v2762_v21 = vadd.f32 %v2761_v32, %v2760_v28  ;;  %v2768_v35 = vrot.slane %v2767_v54, 2  ;;  %3882 = vrcp.f32 %v2725_v33 }
0x17c5   : > { %v2769_v36 = vadd.f32 %v2768_v35, %v2767_v54  ;;  %v2763_v37 = vrot.slane %v2762_v21, 1 }
0x17c7   : > { %v2770_v17 = vrot.slane %v2769_v36, 1  ;;  %v2764_v19 = vadd.f32 %v2763_v37, %v2762_v21 }
0x17c9   : > { %v2771_v38 = vadd.f32 %v2770_v17, %v2769_v36  ;;  %3884 = vrcp.f32 %v2764_v19 }
0x17cb   : > { %v3881_v39 = vpop.eup %3880  ;;  %3886 = vrcp.f32 %v2771_v38 }
0x17cc   : > { %v2728_v41 = vmul.f32 %v3881_v39, %v3865_v61  ;;  %v2730_v20 = vmul.f32 %v3881_v39, %v3867_v62 }
0x17cd   : > { %v3883_v26 = vpop.eup %3882 }
0x17ce   : > { %v2729_v0 = vmul.f32 %v3883_v26, %v3869_v22  ;;  %v2731_v42 = vmul.f32 %v3883_v26, %v3871_v4  ;;  %v3690_v43 = vpack.c.bf16 %v2730_v20, %v2728_v41  ;;  %v2858_v22 = vmul.f32 %v3917_v57, %v2857_v59 }
0x17d0   : > { %v3688_v44 = vpack.c.bf16 %v2731_v42, %v2729_v0 }
0x17d2   : > { %3689 = vmatprep.subr.bf16.mxu1 %v3688_v44 }
0x17d3   : > { %v3885_v45 = vpop.eup %3884  ;;  %3691 = vmatpush1.bf16.msra.mxu1 %v3690_v43 }
0x17d4   : > { %v2774_v48 = vmul.f32 %v3885_v45, %v3873_v10  ;;  %v2776_v46 = vmul.f32 %v3885_v45, %v3875_v14  ;;  %v3929_v10 = vmov (%p2564_p5), 0  }
0x17d5   : > { %v3887_v5 = vpop.eup %3886  ;;  %3888 = vset.pattern.permute.xlu0 (%p2564_p5), %v3929_v10 }
0x17d6   : > { %v2775_v47 = vmul.f32 %v3887_v5, %v3877_v15  ;;  %v2777_v50 = vmul.f32 %v3887_v5, %v3879_v23  ;;  %v3694_v52 = vpack.c.bf16 %v2776_v46, %v2774_v48  ;;  %2871 = vperm.xlu0 (%p2564_p5), %3888, %v2868_v9  }
0x17d8   : > { %v3692_v34 = vpack.c.bf16 %v2777_v50, %v2775_v47 }
0x17da   : > { %3693 = vmatprep.subr.bf16.mxu1 %v3692_v34 }
0x17db   : > { %3695 = vmatpush1.bf16.msra.mxu1 %v3694_v52 }
0x17de   : > { %3106 = vmatmul.mubr.msk.f32.vlgmr.msra.gmra.mrb[0].mxu1 %vm94_vm0, %v4586_v63 }
0x1855   :  { %v2872_v1 = vpop.permute.xlu0 (%p2564_p5), %2871 }
0x18b1   : > { %v2852_v40 = vpop.f32.mrb[0].mxu1 }
0x18b2   : > { %v2853_v60 = vadd.f32 %v2852_v40, %v2781_v56  ;;  %v2854_v2 = vpop.f32.mrb[1].mxu1 }
0x18b3   : > { %v2855_v61 = vadd.f32 %v2854_v2, %v2781_v56 }
0x18b4   : > { %v2860_v62 = vmul.f32 %v2859_v58, %v2853_v60 }
0x18b5   : > { %v2861_v3 = vmul.f32 %v2859_v58, %v2855_v61  ;;  %2566 = sbr.rel (!%p2564_p5) target bundleno = 5817 (0x16b9), region = 126 }
0x18b7   : > { %v2864_v4 = vcombine.low %v2860_v62, %v2861_v3 }
0x18b9   : > { %v2866_v6 = vadd.f32 %v2864_v4, %v2858_v22  }
0x18bb   : > { %v4677_v57 = vmov %v2866_v6  ;;  %v2875_v7 = vcombine.high (%p2564_p5), %v2866_v6, %v2866_v6 }
0x18bc   :  { %v2867_v57 = vld [vmem:[%s4655_s19] sm:$0x7] }
0x18bd   :  { %3107 = vmatprep.subr.msk.mxu0 %vm2592_vm6, %v2875_v7 }
0x18be   :  { %3108 = vmatpush1.msk.msra.mxu0 %vm2592_vm6, %v2866_v6 }
0x18bf   :  { %3109 = vmatmul.mubr.msk.f32.vlgmr.msra.gmra.mrb[0].mxu0 %vm2579_vm7, %v2867_v57 }
0x1992   :  { %v2951_v51 = vpop.f32.mrb[0].mxu0 }
0x1993   :  { %v2952_v53 = vadd.f32 %v2951_v51, %v2872_v1  ;;  %v2953_v55 = vpop.f32.mrb[1].mxu0 }
0x1994   :  { %v2954_v63 = vadd.f32 %v2953_v55, %v2872_v1 }
0x1995   :  { %3889 = vtanh.f32 %v2952_v53 }
0x1996   :  { %3891 = vtanh.f32 %v2954_v63 }
0x199f   :  { %v3890_v11 = vpop.eup %3889 }
0x19a0   :  { %v3892_v12 = vpop.eup %3891  ;;  %v2958_v14 = vadd.f32 1.0, %v3890_v11 }
0x19a1   :  { %v2959_v15 = vadd.f32 1.0, %v3892_v12 }
0x19a2   :  { %v2960_v16 = vmul.f32 0.5, %v2958_v14 }
0x19a3   :  { %v2961_v13 = vmul.f32 0.5, %v2959_v15 }
0x19a5   :  { %v2964_v18 = vcombine.low %v2960_v16, %v2961_v13 }
0x19a7   :  { %2966 = vst [vmem:[%s4657_s21] sm:$0x77] %v2964_v18 }
0x19a8   :  { %2971 = vsyncpa [#allocation3], 1 }

</bundles_post_ra>
